<compile_context>
chip_gen: v7x
topology: tpu7x:2x2x1
jax: 0.10.0
libtpu: 0.0.40
codegen_flags: <defaults>
</compile_context>

<pallas_src>
import jax
import jax.numpy as jnp
from jax.experimental import pallas as pl
from jax.experimental.pallas import tpu as pltpu


def _decoder_gru_kernel(z_ref, w_in_ref, b_in_ref,
                        w_ih_r_ref, w_ih_z_ref, w_ih_n_ref,
                        b_xr_ref, b_xz_ref, b_xn_ref,
                        w_hh_r_ref, w_hh_z_ref, w_hh_n_ref,
                        b_hn_ref,
                        w_out_steps_ref, b_out_ref,
                        out_ref):
    """Single-invocation GRU decoder. out_ref: (B, out_len*W) lane-dense slab."""
    out_len = w_out_steps_ref.shape[0]

    # ---- prologue (runs once): linear_in + relu, constant input-gate preacts ----
    x = jnp.dot(z_ref[...], w_in_ref[...],
                preferred_element_type=jnp.float32) + b_in_ref[...]
    x = jnp.maximum(x, 0.0)                                   # relu(linear_in(z))

    # x is identical at every timestep -> hoist x @ W_ih out of the recurrence.
    # b_hr / b_hz already folded into b_xr / b_xz by the wrapper.
    xg_r = jnp.dot(x, w_ih_r_ref[...], preferred_element_type=jnp.float32) + b_xr_ref[...]
    xg_z = jnp.dot(x, w_ih_z_ref[...], preferred_element_type=jnp.float32) + b_xz_ref[...]
    xg_n = jnp.dot(x, w_ih_n_ref[...], preferred_element_type=jnp.float32) + b_xn_ref[...]

    w_hh_r = w_hh_r_ref[...]
    w_hh_z = w_hh_z_ref[...]
    w_hh_n = w_hh_n_ref[...]
    b_hn = b_hn_ref[...]

    h = jnp.zeros_like(xg_r)                                  # h0 = 0, (B, H)

    # Output accumulator: b_out already tiled across the out_len lane blocks.
    o_acc = jnp.broadcast_to(b_out_ref[...], out_ref.shape).astype(jnp.float32)

    # ---- fully unrolled recurrence (out_len is tiny & static) ----
    for t in range(out_len):
        hg_r = jnp.dot(h, w_hh_r, preferred_element_type=jnp.float32)
        hg_z = jnp.dot(h, w_hh_z, preferred_element_type=jnp.float32)
        hg_n = jnp.dot(h, w_hh_n, preferred_element_type=jnp.float32) + b_hn

        r = jax.nn.sigmoid(xg_r + hg_r)
        u = jax.nn.sigmoid(xg_z + hg_z)
        n = jnp.tanh(xg_n + r * hg_n)                         # b_hn inside r*(...), as PyTorch
        h = (1.0 - u) * n + u * h

        # Block-padded weight slice puts step t's projection into lanes
        # [t*W, (t+1)*W); the accumulate is a full-vreg vadd off the critical path.
        o_acc = o_acc + jnp.dot(jnp.maximum(h, 0.0), w_out_steps_ref[t],
                                preferred_element_type=jnp.float32)

    out_ref[...] = o_acc                                      # ONE unmasked lane-dense store


def decoder_forward(z, kparams, z_slice, out_len):
    """Slice z (glue), run the single-shot Pallas GRU-decoder kernel, reshape the
    lane-dense (B, out_len*W) slab back to batch-first (B, out_len, W)."""
    z = z[:, z_slice[0]:z_slice[1]]
    B = z.shape[0]
    OW = kparams["w_out_steps"].shape[2]          # out_len * token_cnt
    W = OW // out_len

    vmem = lambda: pl.BlockSpec(memory_space=pltpu.MemorySpace.VMEM)
    args = (z,
            kparams["w_in"], kparams["b_in"],
            kparams["w_ih_r"], kparams["w_ih_z"], kparams["w_ih_n"],
            kparams["b_xr"], kparams["b_xz"], kparams["b_xn"],
            kparams["w_hh_r"], kparams["w_hh_z"], kparams["w_hh_n"],
            kparams["b_hn"],
            kparams["w_out_steps"], kparams["b_out_tiled"])

    flat = pl.pallas_call(
        _decoder_gru_kernel,
        out_shape=jax.ShapeDtypeStruct((B, OW), jnp.float32),
        in_specs=[vmem() for _ in args],
        out_specs=vmem(),
    )(*args)
    return flat.reshape(B, out_len, W)            # free row-major reshape (layout plumbing)


def pack_decoder_params(p, out_len):
    """One-time packing: split combined (H, 3H) GRU matrices into per-gate (H, H)
    blocks, fold b_hr/b_hz into the constant input-gate biases, and build the
    block-padded per-step output weights / tiled output bias."""
    H = p["w_hh"].shape[0]
    W = p["w_out"].shape[1]
    # (out_len, H, out_len*W): step t holds w_out in columns [t*W, (t+1)*W), zeros elsewhere.
    eye = jnp.eye(out_len, dtype=jnp.float32)
    w_out_steps = (eye[:, None, :, None] *
                   p["w_out"][None, :, None, :]).reshape(out_len, H, out_len * W)
    b_out_tiled = jnp.tile(p["b_out"], (1, out_len))          # (1, out_len*W)
    return {
        "w_in": p["w_in"], "b_in": p["b_in"],
        "w_ih_r": p["w_ih"][:, 0:H],
        "w_ih_z": p["w_ih"][:, H:2 * H],
        "w_ih_n": p["w_ih"][:, 2 * H:3 * H],
        "b_xr": p["b_ih"][:, 0:H] + p["b_hh"][:, 0:H],
        "b_xz": p["b_ih"][:, H:2 * H] + p["b_hh"][:, H:2 * H],
        "b_xn": p["b_ih"][:, 2 * H:3 * H],
        "w_hh_r": p["w_hh"][:, 0:H],
        "w_hh_z": p["w_hh"][:, H:2 * H],
        "w_hh_n": p["w_hh"][:, 2 * H:3 * H],
        "b_hn": p["b_hh"][:, 2 * H:3 * H],
        "w_out_steps": w_out_steps,
        "b_out_tiled": b_out_tiled,
    }


def decoder_reference(z, params, z_slice, out_len):
    """Pure-JAX reference mirroring the PyTorch forward (gru architecture)."""
    z = z[:, z_slice[0]:z_slice[1]]
    H = params["w_hh"].shape[1] // 3
    x = jnp.maximum(z @ params["w_in"] + params["b_in"], 0.0)
    xg = x @ params["w_ih"] + params["b_ih"]
    h = jnp.zeros((z.shape[0], H), jnp.float32)
    outs = []
    for _ in range(out_len):
        hg = h @ params["w_hh"] + params["b_hh"]
        r = jax.nn.sigmoid(xg[:, :H] + hg[:, :H])
        u = jax.nn.sigmoid(xg[:, H:2 * H] + hg[:, H:2 * H])
        n = jnp.tanh(xg[:, 2 * H:] + r * hg[:, 2 * H:])
        h = (1.0 - u) * n + u * h
        outs.append(jnp.maximum(h, 0.0) @ params["w_out"] + params["b_out"])
    return jnp.stack(outs, axis=1)


def init_params(key, input_size, hidden_size, out_width):
    """Deterministic parameter init; PyTorch layer shapes, stored pre-transposed (in, out)."""
    ks = jax.random.split(key, 8)
    s = 0.1
    return {
        # nn.Linear(input_size, hidden): weight (H, in) -> stored as (in, H)
        "w_in":  s * jax.random.normal(ks[0], (input_size, hidden_size), jnp.float32),
        "b_in":  s * jax.random.normal(ks[1], (1, hidden_size), jnp.float32),
        # nn.GRU weight_ih_l0 (3H, H) -> (H, 3H); weight_hh_l0 (3H, H) -> (H, 3H)
        "w_ih":  s * jax.random.normal(ks[2], (hidden_size, 3 * hidden_size), jnp.float32),
        "b_ih":  s * jax.random.normal(ks[3], (1, 3 * hidden_size), jnp.float32),
        "w_hh":  s * jax.random.normal(ks[4], (hidden_size, 3 * hidden_size), jnp.float32),
        "b_hh":  s * jax.random.normal(ks[5], (1, 3 * hidden_size), jnp.float32),
        # nn.Linear(hidden, token_cnt): weight (W, H) -> (H, W)
        "w_out": s * jax.random.normal(ks[6], (hidden_size, out_width), jnp.float32),
        "b_out": s * jax.random.normal(ks[7], (1, out_width), jnp.float32),
    }


if __name__ == "__main__":
    # Small config consistent with the module:
    #   cfg.z_size = 48, z_slice -> (8, 40)  => input_size = 32
    #   cfg.decoder.size_hidden = 32, architecture = 'gru'
    #   cfg.io_format.seq_len = 8, cfg.io_format.token_cnt = 16
    B, Z_SIZE = 2, 48
    Z_SLICE = (8, 40)
    INPUT_SIZE = Z_SLICE[1] - Z_SLICE[0]
    HIDDEN = 32
    OUT_LEN, TOKEN_CNT = 8, 16

    key = jax.random.PRNGKey(0)
    kz, kp = jax.random.split(key)
    z = jax.random.normal(kz, (B, Z_SIZE), jnp.float32)
    params = init_params(kp, INPUT_SIZE, HIDDEN, TOKEN_CNT)
    kparams = jax.tree.map(jax.block_until_ready,
                           pack_decoder_params(params, OUT_LEN))  # one-time packing

    out = decoder_forward(z, kparams, Z_SLICE, OUT_LEN)
    out = jax.block_until_ready(out)

    ref = decoder_reference(z, params, Z_SLICE, OUT_LEN)
    assert out.shape == (B, OUT_LEN, TOKEN_CNT), out.shape
    assert jnp.allclose(out, ref, atol=1e-5, rtol=1e-5), "mismatch vs reference"

    # TODO(synk): 'lstm', 'lstm-large' and the MLP architectures are config branches
    # not exercised here; only the 'gru' branch is implemented as a kernel.
    print("KERNEL_OK")
</pallas_src>

<mosaic_0001>
module attributes {stable_mosaic.version = 11 : i64} {
  func.func @_decoder_gru_kernel(%arg0: memref<2x32xf32, #tpu.memory_space<vmem>>, %arg1: memref<32x32xf32, #tpu.memory_space<vmem>>, %arg2: memref<1x32xf32, #tpu.memory_space<vmem>>, %arg3: memref<32x32xf32, #tpu.memory_space<vmem>>, %arg4: memref<32x32xf32, #tpu.memory_space<vmem>>, %arg5: memref<32x32xf32, #tpu.memory_space<vmem>>, %arg6: memref<1x32xf32, #tpu.memory_space<vmem>>, %arg7: memref<1x32xf32, #tpu.memory_space<vmem>>, %arg8: memref<1x32xf32, #tpu.memory_space<vmem>>, %arg9: memref<32x32xf32, #tpu.memory_space<vmem>>, %arg10: memref<32x32xf32, #tpu.memory_space<vmem>>, %arg11: memref<32x32xf32, #tpu.memory_space<vmem>>, %arg12: memref<1x32xf32, #tpu.memory_space<vmem>>, %arg13: memref<8x32x128xf32, #tpu.memory_space<vmem>>, %arg14: memref<1x128xf32, #tpu.memory_space<vmem>>, %arg15: memref<2x128xf32, #tpu.memory_space<vmem>>) attributes {dimension_semantics = [], scalar_prefetch = 0 : i64, scratch_operands = 0 : i64, tpu.core_type = #tpu.core_type<tc>} {
    %c0 = arith.constant 0 : index
    %c0_0 = arith.constant 0 : index
    %0 = vector.load %arg0[%c0, %c0_0] : memref<2x32xf32, #tpu.memory_space<vmem>>, vector<2x32xf32>
    %c0_1 = arith.constant 0 : index
    %c0_2 = arith.constant 0 : index
    %1 = vector.load %arg1[%c0_1, %c0_2] : memref<32x32xf32, #tpu.memory_space<vmem>>, vector<32x32xf32>
    %cst = arith.constant dense<0.000000e+00> : vector<2x32xf32>
    %2 = tpu.matmul %0, %1, %cst {dimension_numbers = #tpu.dot_dimension_numbers<[1], [0], [0], [1], [0, 0, 1, 1], [], []>} : vector<2x32xf32>, vector<32x32xf32>, vector<2x32xf32> -> vector<2x32xf32>
    %c0_3 = arith.constant 0 : index
    %c0_4 = arith.constant 0 : index
    %3 = vector.load %arg2[%c0_3, %c0_4] : memref<1x32xf32, #tpu.memory_space<vmem>>, vector<1x32xf32>
    %4 = vector.broadcast %3 : vector<1x32xf32> to vector<2x32xf32>
    %5 = arith.addf %2, %4 : vector<2x32xf32>
    %cst_5 = arith.constant 0.000000e+00 : f32
    %6 = vector.broadcast %cst_5 : f32 to vector<2x32xf32>
    %7 = arith.maximumf %5, %6 : vector<2x32xf32>
    %c0_6 = arith.constant 0 : index
    %c0_7 = arith.constant 0 : index
    %8 = vector.load %arg3[%c0_6, %c0_7] : memref<32x32xf32, #tpu.memory_space<vmem>>, vector<32x32xf32>
    %cst_8 = arith.constant dense<0.000000e+00> : vector<2x32xf32>
    %9 = tpu.matmul %7, %8, %cst_8 {dimension_numbers = #tpu.dot_dimension_numbers<[1], [0], [0], [1], [0, 0, 1, 1], [], []>} : vector<2x32xf32>, vector<32x32xf32>, vector<2x32xf32> -> vector<2x32xf32>
    %c0_9 = arith.constant 0 : index
    %c0_10 = arith.constant 0 : index
    %10 = vector.load %arg6[%c0_9, %c0_10] : memref<1x32xf32, #tpu.memory_space<vmem>>, vector<1x32xf32>
    %11 = vector.broadcast %10 : vector<1x32xf32> to vector<2x32xf32>
    %12 = arith.addf %9, %11 : vector<2x32xf32>
    %c0_11 = arith.constant 0 : index
    %c0_12 = arith.constant 0 : index
    %13 = vector.load %arg4[%c0_11, %c0_12] : memref<32x32xf32, #tpu.memory_space<vmem>>, vector<32x32xf32>
    %cst_13 = arith.constant dense<0.000000e+00> : vector<2x32xf32>
    %14 = tpu.matmul %7, %13, %cst_13 {dimension_numbers = #tpu.dot_dimension_numbers<[1], [0], [0], [1], [0, 0, 1, 1], [], []>} : vector<2x32xf32>, vector<32x32xf32>, vector<2x32xf32> -> vector<2x32xf32>
    %c0_14 = arith.constant 0 : index
    %c0_15 = arith.constant 0 : index
    %15 = vector.load %arg7[%c0_14, %c0_15] : memref<1x32xf32, #tpu.memory_space<vmem>>, vector<1x32xf32>
    %16 = vector.broadcast %15 : vector<1x32xf32> to vector<2x32xf32>
    %17 = arith.addf %14, %16 : vector<2x32xf32>
    %c0_16 = arith.constant 0 : index
    %c0_17 = arith.constant 0 : index
    %18 = vector.load %arg5[%c0_16, %c0_17] : memref<32x32xf32, #tpu.memory_space<vmem>>, vector<32x32xf32>
    %cst_18 = arith.constant dense<0.000000e+00> : vector<2x32xf32>
    %19 = tpu.matmul %7, %18, %cst_18 {dimension_numbers = #tpu.dot_dimension_numbers<[1], [0], [0], [1], [0, 0, 1, 1], [], []>} : vector<2x32xf32>, vector<32x32xf32>, vector<2x32xf32> -> vector<2x32xf32>
    %c0_19 = arith.constant 0 : index
    %c0_20 = arith.constant 0 : index
    %20 = vector.load %arg8[%c0_19, %c0_20] : memref<1x32xf32, #tpu.memory_space<vmem>>, vector<1x32xf32>
    %21 = vector.broadcast %20 : vector<1x32xf32> to vector<2x32xf32>
    %22 = arith.addf %19, %21 : vector<2x32xf32>
    %c0_21 = arith.constant 0 : index
    %c0_22 = arith.constant 0 : index
    %23 = vector.load %arg9[%c0_21, %c0_22] : memref<32x32xf32, #tpu.memory_space<vmem>>, vector<32x32xf32>
    %c0_23 = arith.constant 0 : index
    %c0_24 = arith.constant 0 : index
    %24 = vector.load %arg10[%c0_23, %c0_24] : memref<32x32xf32, #tpu.memory_space<vmem>>, vector<32x32xf32>
    %c0_25 = arith.constant 0 : index
    %c0_26 = arith.constant 0 : index
    %25 = vector.load %arg11[%c0_25, %c0_26] : memref<32x32xf32, #tpu.memory_space<vmem>>, vector<32x32xf32>
    %c0_27 = arith.constant 0 : index
    %c0_28 = arith.constant 0 : index
    %26 = vector.load %arg12[%c0_27, %c0_28] : memref<1x32xf32, #tpu.memory_space<vmem>>, vector<1x32xf32>
    %cst_29 = arith.constant 0.000000e+00 : f32
    %27 = vector.broadcast %cst_29 : f32 to vector<2x32xf32>
    %c0_30 = arith.constant 0 : index
    %c0_31 = arith.constant 0 : index
    %28 = vector.load %arg14[%c0_30, %c0_31] : memref<1x128xf32, #tpu.memory_space<vmem>>, vector<1x128xf32>
    %29 = vector.shape_cast %28 : vector<1x128xf32> to vector<1x128xf32>
    %30 = vector.broadcast %29 : vector<1x128xf32> to vector<2x128xf32>
    %cst_32 = arith.constant dense<0.000000e+00> : vector<2x32xf32>
    %31 = tpu.matmul %27, %23, %cst_32 {dimension_numbers = #tpu.dot_dimension_numbers<[1], [0], [0], [1], [0, 0, 1, 1], [], []>} : vector<2x32xf32>, vector<32x32xf32>, vector<2x32xf32> -> vector<2x32xf32>
    %cst_33 = arith.constant dense<0.000000e+00> : vector<2x32xf32>
    %32 = tpu.matmul %27, %24, %cst_33 {dimension_numbers = #tpu.dot_dimension_numbers<[1], [0], [0], [1], [0, 0, 1, 1], [], []>} : vector<2x32xf32>, vector<32x32xf32>, vector<2x32xf32> -> vector<2x32xf32>
    %cst_34 = arith.constant dense<0.000000e+00> : vector<2x32xf32>
    %33 = tpu.matmul %27, %25, %cst_34 {dimension_numbers = #tpu.dot_dimension_numbers<[1], [0], [0], [1], [0, 0, 1, 1], [], []>} : vector<2x32xf32>, vector<32x32xf32>, vector<2x32xf32> -> vector<2x32xf32>
    %34 = vector.broadcast %26 : vector<1x32xf32> to vector<2x32xf32>
    %35 = arith.addf %33, %34 : vector<2x32xf32>
    %36 = arith.addf %12, %31 : vector<2x32xf32>
    %37 = arith.negf %36 : vector<2x32xf32>
    %38 = math.exp %37 : vector<2x32xf32>
    %cst_35 = arith.constant 1.000000e+00 : f32
    %39 = vector.broadcast %cst_35 : f32 to vector<2x32xf32>
    %40 = arith.addf %39, %38 : vector<2x32xf32>
    %41 = arith.divf %39, %40 : vector<2x32xf32>
    %42 = arith.addf %17, %32 : vector<2x32xf32>
    %43 = arith.negf %42 : vector<2x32xf32>
    %44 = math.exp %43 : vector<2x32xf32>
    %cst_36 = arith.constant 1.000000e+00 : f32
    %45 = vector.broadcast %cst_36 : f32 to vector<2x32xf32>
    %46 = arith.addf %45, %44 : vector<2x32xf32>
    %47 = arith.divf %45, %46 : vector<2x32xf32>
    %48 = arith.mulf %41, %35 : vector<2x32xf32>
    %49 = arith.addf %22, %48 : vector<2x32xf32>
    %50 = math.tanh %49 : vector<2x32xf32>
    %cst_37 = arith.constant 1.000000e+00 : f32
    %51 = vector.broadcast %cst_37 : f32 to vector<2x32xf32>
    %52 = arith.subf %51, %47 : vector<2x32xf32>
    %53 = arith.mulf %52, %50 : vector<2x32xf32>
    %54 = arith.mulf %47, %27 : vector<2x32xf32>
    %55 = arith.addf %53, %54 : vector<2x32xf32>
    %cst_38 = arith.constant 0.000000e+00 : f32
    %56 = vector.broadcast %cst_38 : f32 to vector<2x32xf32>
    %57 = arith.maximumf %55, %56 : vector<2x32xf32>
    %c0_39 = arith.constant 0 : index
    %c0_40 = arith.constant 0 : index
    %c0_41 = arith.constant 0 : index
    %58 = vector.load %arg13[%c0_39, %c0_40, %c0_41] : memref<8x32x128xf32, #tpu.memory_space<vmem>>, vector<1x32x128xf32>
    %59 = vector.shape_cast %58 : vector<1x32x128xf32> to vector<32x128xf32>
    %cst_42 = arith.constant dense<0.000000e+00> : vector<2x128xf32>
    %60 = tpu.matmul %57, %59, %cst_42 {dimension_numbers = #tpu.dot_dimension_numbers<[1], [0], [0], [1], [0, 0, 1, 1], [], []>} : vector<2x32xf32>, vector<32x128xf32>, vector<2x128xf32> -> vector<2x128xf32>
    %61 = arith.addf %30, %60 : vector<2x128xf32>
    %cst_43 = arith.constant dense<0.000000e+00> : vector<2x32xf32>
    %62 = tpu.matmul %55, %23, %cst_43 {dimension_numbers = #tpu.dot_dimension_numbers<[1], [0], [0], [1], [0, 0, 1, 1], [], []>} : vector<2x32xf32>, vector<32x32xf32>, vector<2x32xf32> -> vector<2x32xf32>
    %cst_44 = arith.constant dense<0.000000e+00> : vector<2x32xf32>
    %63 = tpu.matmul %55, %24, %cst_44 {dimension_numbers = #tpu.dot_dimension_numbers<[1], [0], [0], [1], [0, 0, 1, 1], [], []>} : vector<2x32xf32>, vector<32x32xf32>, vector<2x32xf32> -> vector<2x32xf32>
    %cst_45 = arith.constant dense<0.000000e+00> : vector<2x32xf32>
    %64 = tpu.matmul %55, %25, %cst_45 {dimension_numbers = #tpu.dot_dimension_numbers<[1], [0], [0], [1], [0, 0, 1, 1], [], []>} : vector<2x32xf32>, vector<32x32xf32>, vector<2x32xf32> -> vector<2x32xf32>
    %65 = vector.broadcast %26 : vector<1x32xf32> to vector<2x32xf32>
    %66 = arith.addf %64, %65 : vector<2x32xf32>
    %67 = arith.addf %12, %62 : vector<2x32xf32>
    %68 = arith.negf %67 : vector<2x32xf32>
    %69 = math.exp %68 : vector<2x32xf32>
    %cst_46 = arith.constant 1.000000e+00 : f32
    %70 = vector.broadcast %cst_46 : f32 to vector<2x32xf32>
    %71 = arith.addf %70, %69 : vector<2x32xf32>
    %72 = arith.divf %70, %71 : vector<2x32xf32>
    %73 = arith.addf %17, %63 : vector<2x32xf32>
    %74 = arith.negf %73 : vector<2x32xf32>
    %75 = math.exp %74 : vector<2x32xf32>
    %cst_47 = arith.constant 1.000000e+00 : f32
    %76 = vector.broadcast %cst_47 : f32 to vector<2x32xf32>
    %77 = arith.addf %76, %75 : vector<2x32xf32>
    %78 = arith.divf %76, %77 : vector<2x32xf32>
    %79 = arith.mulf %72, %66 : vector<2x32xf32>
    %80 = arith.addf %22, %79 : vector<2x32xf32>
    %81 = math.tanh %80 : vector<2x32xf32>
    %cst_48 = arith.constant 1.000000e+00 : f32
    %82 = vector.broadcast %cst_48 : f32 to vector<2x32xf32>
    %83 = arith.subf %82, %78 : vector<2x32xf32>
    %84 = arith.mulf %83, %81 : vector<2x32xf32>
    %85 = arith.mulf %78, %55 : vector<2x32xf32>
    %86 = arith.addf %84, %85 : vector<2x32xf32>
    %cst_49 = arith.constant 0.000000e+00 : f32
    %87 = vector.broadcast %cst_49 : f32 to vector<2x32xf32>
    %88 = arith.maximumf %86, %87 : vector<2x32xf32>
    %c1 = arith.constant 1 : index
    %c0_50 = arith.constant 0 : index
    %c0_51 = arith.constant 0 : index
    %89 = vector.load %arg13[%c1, %c0_50, %c0_51] : memref<8x32x128xf32, #tpu.memory_space<vmem>>, vector<1x32x128xf32>
    %90 = vector.shape_cast %89 : vector<1x32x128xf32> to vector<32x128xf32>
    %cst_52 = arith.constant dense<0.000000e+00> : vector<2x128xf32>
    %91 = tpu.matmul %88, %90, %cst_52 {dimension_numbers = #tpu.dot_dimension_numbers<[1], [0], [0], [1], [0, 0, 1, 1], [], []>} : vector<2x32xf32>, vector<32x128xf32>, vector<2x128xf32> -> vector<2x128xf32>
    %92 = arith.addf %61, %91 : vector<2x128xf32>
    %cst_53 = arith.constant dense<0.000000e+00> : vector<2x32xf32>
    %93 = tpu.matmul %86, %23, %cst_53 {dimension_numbers = #tpu.dot_dimension_numbers<[1], [0], [0], [1], [0, 0, 1, 1], [], []>} : vector<2x32xf32>, vector<32x32xf32>, vector<2x32xf32> -> vector<2x32xf32>
    %cst_54 = arith.constant dense<0.000000e+00> : vector<2x32xf32>
    %94 = tpu.matmul %86, %24, %cst_54 {dimension_numbers = #tpu.dot_dimension_numbers<[1], [0], [0], [1], [0, 0, 1, 1], [], []>} : vector<2x32xf32>, vector<32x32xf32>, vector<2x32xf32> -> vector<2x32xf32>
    %cst_55 = arith.constant dense<0.000000e+00> : vector<2x32xf32>
    %95 = tpu.matmul %86, %25, %cst_55 {dimension_numbers = #tpu.dot_dimension_numbers<[1], [0], [0], [1], [0, 0, 1, 1], [], []>} : vector<2x32xf32>, vector<32x32xf32>, vector<2x32xf32> -> vector<2x32xf32>
    %96 = vector.broadcast %26 : vector<1x32xf32> to vector<2x32xf32>
    %97 = arith.addf %95, %96 : vector<2x32xf32>
    %98 = arith.addf %12, %93 : vector<2x32xf32>
    %99 = arith.negf %98 : vector<2x32xf32>
    %100 = math.exp %99 : vector<2x32xf32>
    %cst_56 = arith.constant 1.000000e+00 : f32
    %101 = vector.broadcast %cst_56 : f32 to vector<2x32xf32>
    %102 = arith.addf %101, %100 : vector<2x32xf32>
    %103 = arith.divf %101, %102 : vector<2x32xf32>
    %104 = arith.addf %17, %94 : vector<2x32xf32>
    %105 = arith.negf %104 : vector<2x32xf32>
    %106 = math.exp %105 : vector<2x32xf32>
    %cst_57 = arith.constant 1.000000e+00 : f32
    %107 = vector.broadcast %cst_57 : f32 to vector<2x32xf32>
    %108 = arith.addf %107, %106 : vector<2x32xf32>
    %109 = arith.divf %107, %108 : vector<2x32xf32>
    %110 = arith.mulf %103, %97 : vector<2x32xf32>
    %111 = arith.addf %22, %110 : vector<2x32xf32>
    %112 = math.tanh %111 : vector<2x32xf32>
    %cst_58 = arith.constant 1.000000e+00 : f32
    %113 = vector.broadcast %cst_58 : f32 to vector<2x32xf32>
    %114 = arith.subf %113, %109 : vector<2x32xf32>
    %115 = arith.mulf %114, %112 : vector<2x32xf32>
    %116 = arith.mulf %109, %86 : vector<2x32xf32>
    %117 = arith.addf %115, %116 : vector<2x32xf32>
    %cst_59 = arith.constant 0.000000e+00 : f32
    %118 = vector.broadcast %cst_59 : f32 to vector<2x32xf32>
    %119 = arith.maximumf %117, %118 : vector<2x32xf32>
    %c2 = arith.constant 2 : index
    %c0_60 = arith.constant 0 : index
    %c0_61 = arith.constant 0 : index
    %120 = vector.load %arg13[%c2, %c0_60, %c0_61] : memref<8x32x128xf32, #tpu.memory_space<vmem>>, vector<1x32x128xf32>
    %121 = vector.shape_cast %120 : vector<1x32x128xf32> to vector<32x128xf32>
    %cst_62 = arith.constant dense<0.000000e+00> : vector<2x128xf32>
    %122 = tpu.matmul %119, %121, %cst_62 {dimension_numbers = #tpu.dot_dimension_numbers<[1], [0], [0], [1], [0, 0, 1, 1], [], []>} : vector<2x32xf32>, vector<32x128xf32>, vector<2x128xf32> -> vector<2x128xf32>
    %123 = arith.addf %92, %122 : vector<2x128xf32>
    %cst_63 = arith.constant dense<0.000000e+00> : vector<2x32xf32>
    %124 = tpu.matmul %117, %23, %cst_63 {dimension_numbers = #tpu.dot_dimension_numbers<[1], [0], [0], [1], [0, 0, 1, 1], [], []>} : vector<2x32xf32>, vector<32x32xf32>, vector<2x32xf32> -> vector<2x32xf32>
    %cst_64 = arith.constant dense<0.000000e+00> : vector<2x32xf32>
    %125 = tpu.matmul %117, %24, %cst_64 {dimension_numbers = #tpu.dot_dimension_numbers<[1], [0], [0], [1], [0, 0, 1, 1], [], []>} : vector<2x32xf32>, vector<32x32xf32>, vector<2x32xf32> -> vector<2x32xf32>
    %cst_65 = arith.constant dense<0.000000e+00> : vector<2x32xf32>
    %126 = tpu.matmul %117, %25, %cst_65 {dimension_numbers = #tpu.dot_dimension_numbers<[1], [0], [0], [1], [0, 0, 1, 1], [], []>} : vector<2x32xf32>, vector<32x32xf32>, vector<2x32xf32> -> vector<2x32xf32>
    %127 = vector.broadcast %26 : vector<1x32xf32> to vector<2x32xf32>
    %128 = arith.addf %126, %127 : vector<2x32xf32>
    %129 = arith.addf %12, %124 : vector<2x32xf32>
    %130 = arith.negf %129 : vector<2x32xf32>
    %131 = math.exp %130 : vector<2x32xf32>
    %cst_66 = arith.constant 1.000000e+00 : f32
    %132 = vector.broadcast %cst_66 : f32 to vector<2x32xf32>
    %133 = arith.addf %132, %131 : vector<2x32xf32>
    %134 = arith.divf %132, %133 : vector<2x32xf32>
    %135 = arith.addf %17, %125 : vector<2x32xf32>
    %136 = arith.negf %135 : vector<2x32xf32>
    %137 = math.exp %136 : vector<2x32xf32>
    %cst_67 = arith.constant 1.000000e+00 : f32
    %138 = vector.broadcast %cst_67 : f32 to vector<2x32xf32>
    %139 = arith.addf %138, %137 : vector<2x32xf32>
    %140 = arith.divf %138, %139 : vector<2x32xf32>
    %141 = arith.mulf %134, %128 : vector<2x32xf32>
    %142 = arith.addf %22, %141 : vector<2x32xf32>
    %143 = math.tanh %142 : vector<2x32xf32>
    %cst_68 = arith.constant 1.000000e+00 : f32
    %144 = vector.broadcast %cst_68 : f32 to vector<2x32xf32>
    %145 = arith.subf %144, %140 : vector<2x32xf32>
    %146 = arith.mulf %145, %143 : vector<2x32xf32>
    %147 = arith.mulf %140, %117 : vector<2x32xf32>
    %148 = arith.addf %146, %147 : vector<2x32xf32>
    %cst_69 = arith.constant 0.000000e+00 : f32
    %149 = vector.broadcast %cst_69 : f32 to vector<2x32xf32>
    %150 = arith.maximumf %148, %149 : vector<2x32xf32>
    %c3 = arith.constant 3 : index
    %c0_70 = arith.constant 0 : index
    %c0_71 = arith.constant 0 : index
    %151 = vector.load %arg13[%c3, %c0_70, %c0_71] : memref<8x32x128xf32, #tpu.memory_space<vmem>>, vector<1x32x128xf32>
    %152 = vector.shape_cast %151 : vector<1x32x128xf32> to vector<32x128xf32>
    %cst_72 = arith.constant dense<0.000000e+00> : vector<2x128xf32>
    %153 = tpu.matmul %150, %152, %cst_72 {dimension_numbers = #tpu.dot_dimension_numbers<[1], [0], [0], [1], [0, 0, 1, 1], [], []>} : vector<2x32xf32>, vector<32x128xf32>, vector<2x128xf32> -> vector<2x128xf32>
    %154 = arith.addf %123, %153 : vector<2x128xf32>
    %cst_73 = arith.constant dense<0.000000e+00> : vector<2x32xf32>
    %155 = tpu.matmul %148, %23, %cst_73 {dimension_numbers = #tpu.dot_dimension_numbers<[1], [0], [0], [1], [0, 0, 1, 1], [], []>} : vector<2x32xf32>, vector<32x32xf32>, vector<2x32xf32> -> vector<2x32xf32>
    %cst_74 = arith.constant dense<0.000000e+00> : vector<2x32xf32>
    %156 = tpu.matmul %148, %24, %cst_74 {dimension_numbers = #tpu.dot_dimension_numbers<[1], [0], [0], [1], [0, 0, 1, 1], [], []>} : vector<2x32xf32>, vector<32x32xf32>, vector<2x32xf32> -> vector<2x32xf32>
    %cst_75 = arith.constant dense<0.000000e+00> : vector<2x32xf32>
    %157 = tpu.matmul %148, %25, %cst_75 {dimension_numbers = #tpu.dot_dimension_numbers<[1], [0], [0], [1], [0, 0, 1, 1], [], []>} : vector<2x32xf32>, vector<32x32xf32>, vector<2x32xf32> -> vector<2x32xf32>
    %158 = vector.broadcast %26 : vector<1x32xf32> to vector<2x32xf32>
    %159 = arith.addf %157, %158 : vector<2x32xf32>
    %160 = arith.addf %12, %155 : vector<2x32xf32>
    %161 = arith.negf %160 : vector<2x32xf32>
    %162 = math.exp %161 : vector<2x32xf32>
    %cst_76 = arith.constant 1.000000e+00 : f32
    %163 = vector.broadcast %cst_76 : f32 to vector<2x32xf32>
    %164 = arith.addf %163, %162 : vector<2x32xf32>
    %165 = arith.divf %163, %164 : vector<2x32xf32>
    %166 = arith.addf %17, %156 : vector<2x32xf32>
    %167 = arith.negf %166 : vector<2x32xf32>
    %168 = math.exp %167 : vector<2x32xf32>
    %cst_77 = arith.constant 1.000000e+00 : f32
    %169 = vector.broadcast %cst_77 : f32 to vector<2x32xf32>
    %170 = arith.addf %169, %168 : vector<2x32xf32>
    %171 = arith.divf %169, %170 : vector<2x32xf32>
    %172 = arith.mulf %165, %159 : vector<2x32xf32>
    %173 = arith.addf %22, %172 : vector<2x32xf32>
    %174 = math.tanh %173 : vector<2x32xf32>
    %cst_78 = arith.constant 1.000000e+00 : f32
    %175 = vector.broadcast %cst_78 : f32 to vector<2x32xf32>
    %176 = arith.subf %175, %171 : vector<2x32xf32>
    %177 = arith.mulf %176, %174 : vector<2x32xf32>
    %178 = arith.mulf %171, %148 : vector<2x32xf32>
    %179 = arith.addf %177, %178 : vector<2x32xf32>
    %cst_79 = arith.constant 0.000000e+00 : f32
    %180 = vector.broadcast %cst_79 : f32 to vector<2x32xf32>
    %181 = arith.maximumf %179, %180 : vector<2x32xf32>
    %c4 = arith.constant 4 : index
    %c0_80 = arith.constant 0 : index
    %c0_81 = arith.constant 0 : index
    %182 = vector.load %arg13[%c4, %c0_80, %c0_81] : memref<8x32x128xf32, #tpu.memory_space<vmem>>, vector<1x32x128xf32>
    %183 = vector.shape_cast %182 : vector<1x32x128xf32> to vector<32x128xf32>
    %cst_82 = arith.constant dense<0.000000e+00> : vector<2x128xf32>
    %184 = tpu.matmul %181, %183, %cst_82 {dimension_numbers = #tpu.dot_dimension_numbers<[1], [0], [0], [1], [0, 0, 1, 1], [], []>} : vector<2x32xf32>, vector<32x128xf32>, vector<2x128xf32> -> vector<2x128xf32>
    %185 = arith.addf %154, %184 : vector<2x128xf32>
    %cst_83 = arith.constant dense<0.000000e+00> : vector<2x32xf32>
    %186 = tpu.matmul %179, %23, %cst_83 {dimension_numbers = #tpu.dot_dimension_numbers<[1], [0], [0], [1], [0, 0, 1, 1], [], []>} : vector<2x32xf32>, vector<32x32xf32>, vector<2x32xf32> -> vector<2x32xf32>
    %cst_84 = arith.constant dense<0.000000e+00> : vector<2x32xf32>
    %187 = tpu.matmul %179, %24, %cst_84 {dimension_numbers = #tpu.dot_dimension_numbers<[1], [0], [0], [1], [0, 0, 1, 1], [], []>} : vector<2x32xf32>, vector<32x32xf32>, vector<2x32xf32> -> vector<2x32xf32>
    %cst_85 = arith.constant dense<0.000000e+00> : vector<2x32xf32>
    %188 = tpu.matmul %179, %25, %cst_85 {dimension_numbers = #tpu.dot_dimension_numbers<[1], [0], [0], [1], [0, 0, 1, 1], [], []>} : vector<2x32xf32>, vector<32x32xf32>, vector<2x32xf32> -> vector<2x32xf32>
    %189 = vector.broadcast %26 : vector<1x32xf32> to vector<2x32xf32>
    %190 = arith.addf %188, %189 : vector<2x32xf32>
    %191 = arith.addf %12, %186 : vector<2x32xf32>
    %192 = arith.negf %191 : vector<2x32xf32>
    %193 = math.exp %192 : vector<2x32xf32>
    %cst_86 = arith.constant 1.000000e+00 : f32
    %194 = vector.broadcast %cst_86 : f32 to vector<2x32xf32>
    %195 = arith.addf %194, %193 : vector<2x32xf32>
    %196 = arith.divf %194, %195 : vector<2x32xf32>
    %197 = arith.addf %17, %187 : vector<2x32xf32>
    %198 = arith.negf %197 : vector<2x32xf32>
    %199 = math.exp %198 : vector<2x32xf32>
    %cst_87 = arith.constant 1.000000e+00 : f32
    %200 = vector.broadcast %cst_87 : f32 to vector<2x32xf32>
    %201 = arith.addf %200, %199 : vector<2x32xf32>
    %202 = arith.divf %200, %201 : vector<2x32xf32>
    %203 = arith.mulf %196, %190 : vector<2x32xf32>
    %204 = arith.addf %22, %203 : vector<2x32xf32>
    %205 = math.tanh %204 : vector<2x32xf32>
    %cst_88 = arith.constant 1.000000e+00 : f32
    %206 = vector.broadcast %cst_88 : f32 to vector<2x32xf32>
    %207 = arith.subf %206, %202 : vector<2x32xf32>
    %208 = arith.mulf %207, %205 : vector<2x32xf32>
    %209 = arith.mulf %202, %179 : vector<2x32xf32>
    %210 = arith.addf %208, %209 : vector<2x32xf32>
    %cst_89 = arith.constant 0.000000e+00 : f32
    %211 = vector.broadcast %cst_89 : f32 to vector<2x32xf32>
    %212 = arith.maximumf %210, %211 : vector<2x32xf32>
    %c5 = arith.constant 5 : index
    %c0_90 = arith.constant 0 : index
    %c0_91 = arith.constant 0 : index
    %213 = vector.load %arg13[%c5, %c0_90, %c0_91] : memref<8x32x128xf32, #tpu.memory_space<vmem>>, vector<1x32x128xf32>
    %214 = vector.shape_cast %213 : vector<1x32x128xf32> to vector<32x128xf32>
    %cst_92 = arith.constant dense<0.000000e+00> : vector<2x128xf32>
    %215 = tpu.matmul %212, %214, %cst_92 {dimension_numbers = #tpu.dot_dimension_numbers<[1], [0], [0], [1], [0, 0, 1, 1], [], []>} : vector<2x32xf32>, vector<32x128xf32>, vector<2x128xf32> -> vector<2x128xf32>
    %216 = arith.addf %185, %215 : vector<2x128xf32>
    %cst_93 = arith.constant dense<0.000000e+00> : vector<2x32xf32>
    %217 = tpu.matmul %210, %23, %cst_93 {dimension_numbers = #tpu.dot_dimension_numbers<[1], [0], [0], [1], [0, 0, 1, 1], [], []>} : vector<2x32xf32>, vector<32x32xf32>, vector<2x32xf32> -> vector<2x32xf32>
    %cst_94 = arith.constant dense<0.000000e+00> : vector<2x32xf32>
    %218 = tpu.matmul %210, %24, %cst_94 {dimension_numbers = #tpu.dot_dimension_numbers<[1], [0], [0], [1], [0, 0, 1, 1], [], []>} : vector<2x32xf32>, vector<32x32xf32>, vector<2x32xf32> -> vector<2x32xf32>
    %cst_95 = arith.constant dense<0.000000e+00> : vector<2x32xf32>
    %219 = tpu.matmul %210, %25, %cst_95 {dimension_numbers = #tpu.dot_dimension_numbers<[1], [0], [0], [1], [0, 0, 1, 1], [], []>} : vector<2x32xf32>, vector<32x32xf32>, vector<2x32xf32> -> vector<2x32xf32>
    %220 = vector.broadcast %26 : vector<1x32xf32> to vector<2x32xf32>
    %221 = arith.addf %219, %220 : vector<2x32xf32>
    %222 = arith.addf %12, %217 : vector<2x32xf32>
    %223 = arith.negf %222 : vector<2x32xf32>
    %224 = math.exp %223 : vector<2x32xf32>
    %cst_96 = arith.constant 1.000000e+00 : f32
    %225 = vector.broadcast %cst_96 : f32 to vector<2x32xf32>
    %226 = arith.addf %225, %224 : vector<2x32xf32>
    %227 = arith.divf %225, %226 : vector<2x32xf32>
    %228 = arith.addf %17, %218 : vector<2x32xf32>
    %229 = arith.negf %228 : vector<2x32xf32>
    %230 = math.exp %229 : vector<2x32xf32>
    %cst_97 = arith.constant 1.000000e+00 : f32
    %231 = vector.broadcast %cst_97 : f32 to vector<2x32xf32>
    %232 = arith.addf %231, %230 : vector<2x32xf32>
    %233 = arith.divf %231, %232 : vector<2x32xf32>
    %234 = arith.mulf %227, %221 : vector<2x32xf32>
    %235 = arith.addf %22, %234 : vector<2x32xf32>
    %236 = math.tanh %235 : vector<2x32xf32>
    %cst_98 = arith.constant 1.000000e+00 : f32
    %237 = vector.broadcast %cst_98 : f32 to vector<2x32xf32>
    %238 = arith.subf %237, %233 : vector<2x32xf32>
    %239 = arith.mulf %238, %236 : vector<2x32xf32>
    %240 = arith.mulf %233, %210 : vector<2x32xf32>
    %241 = arith.addf %239, %240 : vector<2x32xf32>
    %cst_99 = arith.constant 0.000000e+00 : f32
    %242 = vector.broadcast %cst_99 : f32 to vector<2x32xf32>
    %243 = arith.maximumf %241, %242 : vector<2x32xf32>
    %c6 = arith.constant 6 : index
    %c0_100 = arith.constant 0 : index
    %c0_101 = arith.constant 0 : index
    %244 = vector.load %arg13[%c6, %c0_100, %c0_101] : memref<8x32x128xf32, #tpu.memory_space<vmem>>, vector<1x32x128xf32>
    %245 = vector.shape_cast %244 : vector<1x32x128xf32> to vector<32x128xf32>
    %cst_102 = arith.constant dense<0.000000e+00> : vector<2x128xf32>
    %246 = tpu.matmul %243, %245, %cst_102 {dimension_numbers = #tpu.dot_dimension_numbers<[1], [0], [0], [1], [0, 0, 1, 1], [], []>} : vector<2x32xf32>, vector<32x128xf32>, vector<2x128xf32> -> vector<2x128xf32>
    %247 = arith.addf %216, %246 : vector<2x128xf32>
    %cst_103 = arith.constant dense<0.000000e+00> : vector<2x32xf32>
    %248 = tpu.matmul %241, %23, %cst_103 {dimension_numbers = #tpu.dot_dimension_numbers<[1], [0], [0], [1], [0, 0, 1, 1], [], []>} : vector<2x32xf32>, vector<32x32xf32>, vector<2x32xf32> -> vector<2x32xf32>
    %cst_104 = arith.constant dense<0.000000e+00> : vector<2x32xf32>
    %249 = tpu.matmul %241, %24, %cst_104 {dimension_numbers = #tpu.dot_dimension_numbers<[1], [0], [0], [1], [0, 0, 1, 1], [], []>} : vector<2x32xf32>, vector<32x32xf32>, vector<2x32xf32> -> vector<2x32xf32>
    %cst_105 = arith.constant dense<0.000000e+00> : vector<2x32xf32>
    %250 = tpu.matmul %241, %25, %cst_105 {dimension_numbers = #tpu.dot_dimension_numbers<[1], [0], [0], [1], [0, 0, 1, 1], [], []>} : vector<2x32xf32>, vector<32x32xf32>, vector<2x32xf32> -> vector<2x32xf32>
    %251 = vector.broadcast %26 : vector<1x32xf32> to vector<2x32xf32>
    %252 = arith.addf %250, %251 : vector<2x32xf32>
    %253 = arith.addf %12, %248 : vector<2x32xf32>
    %254 = arith.negf %253 : vector<2x32xf32>
    %255 = math.exp %254 : vector<2x32xf32>
    %cst_106 = arith.constant 1.000000e+00 : f32
    %256 = vector.broadcast %cst_106 : f32 to vector<2x32xf32>
    %257 = arith.addf %256, %255 : vector<2x32xf32>
    %258 = arith.divf %256, %257 : vector<2x32xf32>
    %259 = arith.addf %17, %249 : vector<2x32xf32>
    %260 = arith.negf %259 : vector<2x32xf32>
    %261 = math.exp %260 : vector<2x32xf32>
    %cst_107 = arith.constant 1.000000e+00 : f32
    %262 = vector.broadcast %cst_107 : f32 to vector<2x32xf32>
    %263 = arith.addf %262, %261 : vector<2x32xf32>
    %264 = arith.divf %262, %263 : vector<2x32xf32>
    %265 = arith.mulf %258, %252 : vector<2x32xf32>
    %266 = arith.addf %22, %265 : vector<2x32xf32>
    %267 = math.tanh %266 : vector<2x32xf32>
    %cst_108 = arith.constant 1.000000e+00 : f32
    %268 = vector.broadcast %cst_108 : f32 to vector<2x32xf32>
    %269 = arith.subf %268, %264 : vector<2x32xf32>
    %270 = arith.mulf %269, %267 : vector<2x32xf32>
    %271 = arith.mulf %264, %241 : vector<2x32xf32>
    %272 = arith.addf %270, %271 : vector<2x32xf32>
    %cst_109 = arith.constant 0.000000e+00 : f32
    %273 = vector.broadcast %cst_109 : f32 to vector<2x32xf32>
    %274 = arith.maximumf %272, %273 : vector<2x32xf32>
    %c7 = arith.constant 7 : index
    %c0_110 = arith.constant 0 : index
    %c0_111 = arith.constant 0 : index
    %275 = vector.load %arg13[%c7, %c0_110, %c0_111] : memref<8x32x128xf32, #tpu.memory_space<vmem>>, vector<1x32x128xf32>
    %276 = vector.shape_cast %275 : vector<1x32x128xf32> to vector<32x128xf32>
    %cst_112 = arith.constant dense<0.000000e+00> : vector<2x128xf32>
    %277 = tpu.matmul %274, %276, %cst_112 {dimension_numbers = #tpu.dot_dimension_numbers<[1], [0], [0], [1], [0, 0, 1, 1], [], []>} : vector<2x32xf32>, vector<32x128xf32>, vector<2x128xf32> -> vector<2x128xf32>
    %278 = arith.addf %247, %277 : vector<2x128xf32>
    %c0_113 = arith.constant 0 : index
    %c0_114 = arith.constant 0 : index
    %279 = vector.load %arg15[%c0_113, %c0_114] : memref<2x128xf32, #tpu.memory_space<vmem>>, vector<2x128xf32>
    tpu.vector_store %arg15[%c0_113, %c0_114], %278 {strides = array<i32>} : memref<2x128xf32, #tpu.memory_space<vmem>>, vector<2x128xf32>,
    return
  }
}

</mosaic_0001>

<bundles_post_ra>
// kernel: tpu_custom_call.1
= control target key start
LH: loop header
LB: loop body
LE: loop exit
PB: predicated region body
PF: predicated region fallthrough
CT: control target
= control target key end

     0   :  { %s4839_s0 = inlined_call_operand.hbm [shape: f32[2,32], index: 0, kind: input, shape index: {}]   ;;  %s4840_s1 = inlined_call_operand.hbm [shape: f32[32,32], index: 1, kind: input, shape index: {}]   ;;  %s4841_s2 = inlined_call_operand.vmem [shape: f32[1,32], index: 2, kind: input, shape index: {}]   ;;  %s4842_s3 = inlined_call_operand.hbm [shape: f32[32,32], index: 3, kind: input, shape index: {}]   ;;  %s4843_s4 = inlined_call_operand.hbm [shape: f32[32,32], index: 4, kind: input, shape index: {}]   ;;  %s4844_s5 = inlined_call_operand.hbm [shape: f32[32,32], index: 5, kind: input, shape index: {}]   ;;  %s4845_s6 = inlined_call_operand.vmem [shape: f32[1,32], index: 6, kind: input, shape index: {}]   ;;  %s4846_s7 = inlined_call_operand.hbm [shape: f32[1,32], index: 7, kind: input, shape index: {}]   ;;  %s4847_s8 = inlined_call_operand.hbm [shape: f32[1,32], index: 8, kind: input, shape index: {}]   ;;  %s4848_s9 = inlined_call_operand.vmem [shape: f32[32,32], index: 9, kind: input, shape index: {}]   ;;  %s4849_s10 = inlined_call_operand.hbm [shape: f32[32,32], index: 10, kind: input, shape index: {}]   ;;  %s4850_s11 = inlined_call_operand.hbm [shape: f32[32,32], index: 11, kind: input, shape index: {}]   ;;  %s4851_s12 = inlined_call_operand.vmem [shape: f32[1,32], index: 12, kind: input, shape index: {}]   ;;  %s4852_s13 = inlined_call_operand.hbm [shape: f32[8,32,128], index: 13, kind: input, shape index: {}]   ;;  %s4853_s14 = inlined_call_operand.vmem [shape: f32[1,128], index: 14, kind: input, shape index: {}]   ;;  %s4854_s15 = inlined_call_operand.hbm [shape: f32[2,128], index: 15, kind: output, shape index: {}]  }
   0x1   :  { %4856 = sst [smem:[#allocation27_spill]] %s4854_s15 }
   0x2   :  { %20 = vsyncpa [#allocation3], 0 }
   0x3   :  { %21 = vsyncpa [#allocation6], 0 }
   0x4   :  { %22 = vsyncpa [#allocation9], 0 }
   0x5   :  { %23 = vsyncpa [#allocation12], 0 }
   0x6   :  { %24 = vsyncpa [#allocation15], 0 }
   0x7   :  { %25 = vsyncpa [#allocation18], 0 }
   0x8   :  { %26 = vsyncpa [#allocation4], 0  ;;  %s4286_s18 = smov [#allocation5]   ;;  %s4030_s22 = scalar_lea.hbm %s4840_s1, 512 }
   0x9   :  { %s42_s19 = sshll.u32 %s4286_s18, 4  ;;  %p4031_p0 = scmp.ne.s32.totalorder %s4840_s1, %s4030_s22  ;;  %s43_s19 = int_to_ptr.vmem [resolvable:$true] %s42_s19 }
   0xa   :  { %p4034_p1 = scmp.lt.u32.totalorder %s4030_s22, %s4840_s1 }
   0xc   :  { %p4036_p2 = pnand %p4034_p1, %p4031_p0 }
   0xe   :  { %4039 = shalt.err (!%p4036_p2)
}
   0xf   :  { %s4040_s27 = scalar_lea.vmem %s43_s19, 512  ;;  %p4045_p4 = scmp.lt.s32.totalorder %s43_s19, %s43_s19 }
  0x10   :  { %p4041_p3 = scmp.ne.s32.totalorder %s43_s19, %s4040_s27  ;;  %p4046_p5 = scmp.lt.s32.totalorder %s4040_s27, %s4040_s27 }
  0x12   :  { %p4047_p6 = por %p4046_p5, %p4045_p4 }
  0x14   :  { %p4048_p7 = pnand %p4047_p6, %p4041_p3 }
  0x16   :  { %4051 = shalt.err (!%p4048_p7)
}
  0x17   :  { %s4287_s28 = smov 128   ;;  %s4288_s29 = smov 8  }
  0x18   :  { %48 = dma.hbm_to_vmem [thread:$0]  %s4840_s1, 512, %s43_s19, [#allocation6], %s4287_s28, %s4287_s28, %s4288_s29  }
  0x19   :  { %s4289_s17 = smov [#allocation8]   ;;  %s4290_s20 = smov [#allocation11]  }
  0x1a   :  { %s68_s18 = sshll.u32 %s4289_s17, 4  ;;  %s95_s21 = sshll.u32 %s4290_s20, 4  ;;  %s69_s18 = int_to_ptr.vmem [resolvable:$true] %s68_s18  ;;  %s96_s21 = int_to_ptr.vmem [resolvable:$true] %s95_s21 }
  0x1b   :  { %s4052_s24 = scalar_lea.hbm %s4843_s4, 512 }
  0x1c   :  { %p4053_p8 = scmp.ne.s32.totalorder %s4843_s4, %s4052_s24  ;;  %p4056_p9 = scmp.lt.u32.totalorder %s4052_s24, %s4843_s4 }
  0x1e   :  { %p4058_p10 = pnand %p4056_p9, %p4053_p8 }
  0x20   :  { %4061 = shalt.err (!%p4058_p10)
}
  0x21   :  { %s4062_s1 = scalar_lea.vmem %s69_s18, 512  ;;  %p4067_p12 = scmp.lt.s32.totalorder %s69_s18, %s69_s18 }
  0x22   :  { %p4063_p11 = scmp.ne.s32.totalorder %s69_s18, %s4062_s1  ;;  %p4068_p13 = scmp.lt.s32.totalorder %s4062_s1, %s4062_s1 }
  0x24   :  { %p4069_p0 = por %p4068_p13, %p4067_p12 }
  0x26   :  { %p4070_p1 = pnand %p4069_p0, %p4063_p11 }
  0x28   :  { %4073 = shalt.err (!%p4070_p1)
}
  0x29   :  { %74 = dma.hbm_to_vmem [thread:$0]  %s4843_s4, 512, %s69_s18, [#allocation9], %s4287_s28, %s4287_s28, %s4288_s29  }
  0x2a   :  { %s4074_s17 = scalar_lea.hbm %s4846_s7, 16 }
  0x2b   :  { %p4075_p2 = scmp.ne.s32.totalorder %s4846_s7, %s4074_s17  ;;  %p4078_p3 = scmp.lt.u32.totalorder %s4074_s17, %s4846_s7 }
  0x2d   :  { %p4080_p4 = pnand %p4078_p3, %p4075_p2 }
  0x2f   :  { %4083 = shalt.err (!%p4080_p4)
}
  0x30   :  { %s4084_s25 = scalar_lea.vmem %s96_s21, 16  ;;  %s4088_s26 = scalar_lea.vmem %s96_s21, 32 }
  0x31   :  { %p4085_p5 = scmp.ne.s32.totalorder %s96_s21, %s4084_s25  ;;  %p4089_p6 = scmp.lt.s32.totalorder %s96_s21, %s96_s21 }
  0x32   :  { %p4090_p7 = scmp.lt.s32.totalorder %s4088_s26, %s4084_s25 }
  0x34   :  { %p4091_p8 = por %p4090_p7, %p4089_p6 }
  0x36   :  { %p4092_p9 = pnand %p4091_p8, %p4085_p5 }
  0x38   :  { %4095 = shalt.err (!%p4092_p9)
}
  0x39   :  { %98 = dma.hbm_to_vmem [thread:$0]  %s4846_s7, 16, %s96_s21, [#allocation12]  }
  0x3a   :  { %s4291_s27 = smov [#allocation14]   ;;  %s4292_s19 = smov [#allocation2]  }
  0x3b   :  { %s116_s1 = sshll.u32 %s4291_s27, 4  ;;  %s33_s30 = sshll.u32 %s4292_s19, 4  ;;  %s117_s1 = int_to_ptr.vmem [resolvable:$true] %s116_s1  ;;  %s34_s30 = int_to_ptr.vmem [resolvable:$true] %s33_s30 }
  0x3c   :  { %s4096_s17 = scalar_lea.hbm %s4849_s10, 512 }
  0x3d   :  { %p4097_p10 = scmp.ne.s32.totalorder %s4849_s10, %s4096_s17  ;;  %p4100_p11 = scmp.lt.u32.totalorder %s4096_s17, %s4849_s10 }
  0x3f   :  { %p4102_p12 = pnand %p4100_p11, %p4097_p10 }
  0x41   :  { %4105 = shalt.err (!%p4102_p12)
}
  0x42   :  { %s4106_s7 = scalar_lea.vmem %s117_s1, 512  ;;  %p4111_p0 = scmp.lt.s32.totalorder %s117_s1, %s117_s1 }
  0x43   :  { %p4107_p13 = scmp.ne.s32.totalorder %s117_s1, %s4106_s7  ;;  %p4112_p1 = scmp.lt.s32.totalorder %s4106_s7, %s4106_s7 }
  0x45   :  { %p4113_p2 = por %p4112_p1, %p4111_p0 }
  0x47   :  { %p4114_p3 = pnand %p4113_p2, %p4107_p13 }
  0x49   :  { %4117 = shalt.err (!%p4114_p3)
}
  0x4a   :  { %122 = dma.hbm_to_vmem [thread:$0]  %s4849_s10, 512, %s117_s1, [#allocation15], %s4287_s28, %s4287_s28, %s4288_s29  }
  0x4b   :  { %s4118_s18 = scalar_lea.hbm %s4839_s0, 32 }
  0x4c   :  { %p4119_p4 = scmp.ne.s32.totalorder %s4839_s0, %s4118_s18  ;;  %p4122_p5 = scmp.lt.u32.totalorder %s4118_s18, %s4839_s0 }
  0x4e   :  { %p4124_p6 = pnand %p4122_p5, %p4119_p4 }
  0x50   :  { %4127 = shalt.err (!%p4124_p6)
}
  0x51   :  { %s4128_s17 = scalar_lea.vmem %s34_s30, 32  ;;  %p4133_p8 = scmp.lt.s32.totalorder %s34_s30, %s34_s30 }
  0x52   :  { %p4129_p7 = scmp.ne.s32.totalorder %s34_s30, %s4128_s17  ;;  %p4134_p9 = scmp.lt.s32.totalorder %s4128_s17, %s4128_s17 }
  0x54   :  { %p4135_p10 = por %p4134_p9, %p4133_p8 }
  0x56   :  { %p4136_p11 = pnand %p4135_p10, %p4129_p7 }
  0x58   :  { %4139 = shalt.err (!%p4136_p11)
}
  0x59   :  { %36 = dma.hbm_to_vmem [thread:$0]  %s4839_s0, 32, %s34_s30, [#allocation3]  }
  0x5a   :  { %s4293_s20 = smov [#allocation7]   ;;  %s4294_s23 = smov [#allocation10]  }
  0x5b   :  { %s56_s22 = sshll.u32 %s4293_s20, 4  ;;  %s80_s24 = sshll.u32 %s4294_s23, 4  ;;  %s57_s22 = int_to_ptr.vmem [resolvable:$true] %s56_s22  ;;  %s81_s24 = int_to_ptr.vmem [resolvable:$true] %s80_s24 }
  0x5c   :  { %s4140_s25 = scalar_lea.hbm %s4842_s3, 512 }
  0x5d   :  { %p4141_p12 = scmp.ne.s32.totalorder %s4842_s3, %s4140_s25  ;;  %p4144_p13 = scmp.lt.u32.totalorder %s4140_s25, %s4842_s3 }
  0x5f   :  { %p4146_p0 = pnand %p4144_p13, %p4141_p12 }
  0x61   :  { %4149 = shalt.err (!%p4146_p0)
}
  0x62   :  { %s4150_s0 = scalar_lea.vmem %s57_s22, 512  ;;  %p4155_p2 = scmp.lt.s32.totalorder %s57_s22, %s57_s22 }
  0x63   :  { %p4151_p1 = scmp.ne.s32.totalorder %s57_s22, %s4150_s0  ;;  %p4156_p3 = scmp.lt.s32.totalorder %s4150_s0, %s4150_s0 }
  0x65   :  { %p4157_p4 = por %p4156_p3, %p4155_p2 }
  0x67   :  { %p4158_p5 = pnand %p4157_p4, %p4151_p1 }
  0x69   :  { %4161 = shalt.err (!%p4158_p5)
}
  0x6a   :  { %62 = dma.hbm_to_vmem [thread:$0]  %s4842_s3, 512, %s57_s22, [#allocation6], %s4287_s28, %s4287_s28, %s4288_s29  }
  0x6b   :  { %s4162_s17 = scalar_lea.hbm %s4844_s5, 512 }
  0x6c   :  { %p4163_p6 = scmp.ne.s32.totalorder %s4844_s5, %s4162_s17  ;;  %p4166_p7 = scmp.lt.u32.totalorder %s4162_s17, %s4844_s5 }
  0x6e   :  { %p4168_p8 = pnand %p4166_p7, %p4163_p6 }
  0x70   :  { %4171 = shalt.err (!%p4168_p8)
}
  0x71   :  { %s4172_s7 = scalar_lea.vmem %s81_s24, 512  ;;  %p4177_p10 = scmp.lt.s32.totalorder %s81_s24, %s81_s24 }
  0x72   :  { %p4173_p9 = scmp.ne.s32.totalorder %s81_s24, %s4172_s7  ;;  %p4178_p11 = scmp.lt.s32.totalorder %s4172_s7, %s4172_s7 }
  0x74   :  { %p4179_p12 = por %p4178_p11, %p4177_p10 }
  0x76   :  { %p4180_p13 = pnand %p4179_p12, %p4173_p9 }
  0x78   :  { %4183 = shalt.err (!%p4180_p13)
}
  0x79   :  { %86 = dma.hbm_to_vmem [thread:$0]  %s4844_s5, 512, %s81_s24, [#allocation9], %s4287_s28, %s4287_s28, %s4288_s29  }
  0x7a   :  { %s4295_s21 = smov [#allocation13]   ;;  %s4296_s26 = smov [#allocation16]  }
  0x7b   :  { %s105_s25 = sshll.u32 %s4295_s21, 4  ;;  %s128_s4 = sshll.u32 %s4296_s26, 4  ;;  %s106_s25 = int_to_ptr.vmem [resolvable:$true] %s105_s25  ;;  %s129_s4 = int_to_ptr.vmem [resolvable:$true] %s128_s4 }
  0x7c   :  { %s4184_s0 = scalar_lea.hbm %s4847_s8, 16 }
  0x7d   :  { %p4185_p0 = scmp.ne.s32.totalorder %s4847_s8, %s4184_s0  ;;  %p4188_p1 = scmp.lt.u32.totalorder %s4184_s0, %s4847_s8 }
  0x7f   :  { %p4190_p2 = pnand %p4188_p1, %p4185_p0 }
  0x81   :  { %4193 = shalt.err (!%p4190_p2)
}
  0x82   :  { %s4194_s5 = scalar_lea.vmem %s106_s25, 16  ;;  %s4198_s24 = scalar_lea.vmem %s106_s25, 32 }
  0x83   :  { %p4195_p3 = scmp.ne.s32.totalorder %s106_s25, %s4194_s5  ;;  %p4199_p4 = scmp.lt.s32.totalorder %s106_s25, %s106_s25 }
  0x84   :  { %p4200_p5 = scmp.lt.s32.totalorder %s4198_s24, %s4194_s5 }
  0x86   :  { %p4201_p6 = por %p4200_p5, %p4199_p4 }
  0x88   :  { %p4202_p7 = pnand %p4201_p6, %p4195_p3 }
  0x8a   :  { %4205 = shalt.err (!%p4202_p7)
}
  0x8b   :  { %108 = dma.hbm_to_vmem [thread:$0]  %s4847_s8, 16, %s106_s25, [#allocation12]  }
  0x8c   :  { %s4206_s23 = scalar_lea.hbm %s4850_s11, 512 }
  0x8d   :  { %p4207_p8 = scmp.ne.s32.totalorder %s4850_s11, %s4206_s23  ;;  %p4210_p9 = scmp.lt.u32.totalorder %s4206_s23, %s4850_s11 }
  0x8f   :  { %p4212_p10 = pnand %p4210_p9, %p4207_p8 }
  0x91   :  { %4215 = shalt.err (!%p4212_p10)
}
  0x92   :  { %s4216_s26 = scalar_lea.vmem %s129_s4, 512  ;;  %p4221_p12 = scmp.lt.s32.totalorder %s129_s4, %s129_s4 }
  0x93   :  { %p4217_p11 = scmp.ne.s32.totalorder %s129_s4, %s4216_s26  ;;  %p4222_p13 = scmp.lt.s32.totalorder %s4216_s26, %s4216_s26 }
  0x95   :  { %p4223_p0 = por %p4222_p13, %p4221_p12 }
  0x97   :  { %p4224_p1 = pnand %p4223_p0, %p4217_p11 }
  0x99   :  { %4227 = shalt.err (!%p4224_p1)
}
  0x9a   :  { %134 = dma.hbm_to_vmem [thread:$0]  %s4850_s11, 512, %s129_s4, [#allocation15], %s4287_s28, %s4287_s28, %s4288_s29  }
  0x9b   :  { %s4297_s18 = smov [#allocation17]   ;;  %s4228_s19 = scalar_lea.hbm %s4852_s13, 4096 }
  0x9c   :  { %s142_s27 = sshll.u32 %s4297_s18, 4  ;;  %p4229_p2 = scmp.ne.s32.totalorder %s4852_s13, %s4228_s19  ;;  %s143_s27 = int_to_ptr.vmem [resolvable:$true] %s142_s27 }
  0x9d   :  { %p4232_p3 = scmp.lt.u32.totalorder %s4228_s19, %s4852_s13 }
  0x9f   :  { %p4234_p4 = pnand %p4232_p3, %p4229_p2 }
  0xa1   :  { %4237 = shalt.err (!%p4234_p4)
}
  0xa2   :  { %s4238_s17 = scalar_lea.vmem %s143_s27, 4096  ;;  %p4243_p6 = scmp.lt.s32.totalorder %s143_s27, %s143_s27 }
  0xa3   :  { %p4239_p5 = scmp.ne.s32.totalorder %s143_s27, %s4238_s17  ;;  %p4244_p7 = scmp.lt.s32.totalorder %s4238_s17, %s4238_s17 }
  0xa5   :  { %p4245_p8 = por %p4244_p7, %p4243_p6 }
  0xa7   :  { %p4246_p9 = pnand %p4245_p8, %p4239_p5 }
  0xa9   :  { %4249 = shalt.err (!%p4246_p9)
}
  0xaa   :  { %148 = dma.hbm_to_vmem [thread:$0]  %s4852_s13, 4096, %s143_s27, [#allocation18], %s4287_s28, %s4287_s28, %s4288_s29  }
  0xab   :  { %4272 = dma.done.wait [#allocation3], 32  }
  0xac   :  { %4273 = vsyncadd [#allocation3], 4294967264 }
  0xad   :  { %4274 = dma.done.wait [#allocation6], 1024  }
  0xae   :  { %4275 = vsyncadd [#allocation6], 4294966272 }
  0xaf   :  { %4276 = dma.done.wait [#allocation9], 1024  }
  0xb0   :  { %4277 = vsyncadd [#allocation9], 4294966272 }
  0xb1   :  { %4278 = dma.done.wait [#allocation12], 32  }
  0xb2   :  { %4279 = vsyncadd [#allocation12], 4294967264 }
  0xb3   :  { %4280 = dma.done.wait [#allocation15], 1024  }
  0xb4   :  { %4281 = vsyncadd [#allocation15], 4294966272 }
  0xb5   :  { %4282 = dma.done.wait [#allocation18], 4096  }
  0xb6   :  { %4283 = vsyncadd [#allocation18], 4294963200  ;;  %v4298_v0 = vmov 0.0|0.0   ;;  %vm4299_vm0 = vmmov 0   ;;  %v4300_v1 = vmov 0.0   ;;  %v182_v2 = vld [vmem:[#allocation5] sm:$0xff] }
  0xb7   :  { %3703 = vmatprep.subr.bf16.mxu0 %v4298_v0  ;;  %3315 = vmatprep.mubr.msk.f32.mxu0 %vm4299_vm0, %v4300_v1  ;;  %v183_v3 = vld [vmem:[#allocation5 + $0x8] sm:$0xff]  ;;  %v184_v4 = vld [vmem:[#allocation5 + $0x10] sm:$0xff]  ;;  %v185_v6 = vld [vmem:[#allocation5 + $0x18] sm:$0xff]  ;;  %vm193_vm1 = vcmask 261120   ;;  %s4301_s8 = smov [#allocation19]  }
  0xb8   :  { %3709 = vmatprep.subr.bf16.mxu1 %v4298_v0  ;;  %3326 = vmatprep.mubr.msk.f32.mxu1 %vm4299_vm0, %v4300_v1  ;;  %v3704_v5 = vpack.c.bf16 %v183_v3, %v182_v2  ;;  %v268_v7 = vld [vmem:[#allocation7] sm:$0xff]  ;;  %v269_v8 = vld [vmem:[#allocation7 + $0x8] sm:$0xff]  ;;  %v3707_v9 = vpack.c.bf16 %v185_v6, %v184_v4  ;;  %v181_v13 = vld [vmem:[#allocation2] sm:$0x3]  ;;  %s3058_s25 = sshll.u32 %s4301_s8, 4  ;;  %s3059_s25 = int_to_ptr.vmem [resolvable:$true] %s3058_s25 }
  0xb9   :  { %v3710_v10 = vpack.c.bf16 %v269_v8, %v268_v7  ;;  %v352_v11 = vld [vmem:[#allocation8] sm:$0xff]  ;;  %v353_v12 = vld [vmem:[#allocation8 + $0x8] sm:$0xff]  ;;  %v270_v15 = vld [vmem:[#allocation7 + $0x10] sm:$0xff]  ;;  %s4250_s18 = scalar_lea.vmem %s3059_s25, 32  ;;  %p4255_p11 = scmp.lt.s32.totalorder %s3059_s25, %s3059_s25 }
  0xba   :  { %3705 = vmatpush3.bf16.msra.mxu0 %v3704_v5  ;;  %v3716_v14 = vpack.c.bf16 %v353_v12, %v352_v11  ;;  %v271_v16 = vld [vmem:[#allocation7 + $0x18] sm:$0xff]  ;;  %v354_v17 = vld [vmem:[#allocation8 + $0x10] sm:$0xff]  ;;  %v433_v22 = vld [vmem:[#allocation10] sm:$0xff]  ;;  %p4251_p10 = scmp.ne.s32.totalorder %s3059_s25, %s4250_s18  ;;  %p4256_p12 = scmp.lt.s32.totalorder %s4250_s18, %s4250_s18 }
  0xbb   :  { %3706 = vmatprep.subr.bf16.mxu0 %v4298_v0  ;;  %3711 = vmatpush3.bf16.msra.mxu1 %v3710_v10  ;;  %v3713_v18 = vpack.c.bf16 %v271_v16, %v270_v15  ;;  %v355_v19 = vld [vmem:[#allocation8 + $0x18] sm:$0xff]  ;;  %v434_v23 = vld [vmem:[#allocation10 + $0x8] sm:$0xff]  ;;  %v435_v31 = vld [vmem:[#allocation10 + $0x10] sm:$0xff] }
  0xbc   :  { %3712 = vmatprep.subr.bf16.mxu1 %v4298_v0  ;;  %v3719_v20 = vpack.c.bf16 %v355_v19, %v354_v17  ;;  %v3072_v21 = vld [vmem:[%s4841_s2] ss:$0 sm:$0xff]  ;;  %v515_v25 = vld [vmem:[%s4848_s9 + $0x8] sm:$0xff]  ;;  %v3722_v29 = vpack.c.bf16 %v434_v23, %v433_v22  ;;  %v516_v34 = vld [vmem:[%s4848_s9 + $0x10] sm:$0xff]  ;;  %p4257_p13 = por %p4256_p12, %p4255_p11 }
  0xbd   :  { %v514_v24 = vld [vmem:[%s4848_s9] sm:$0xff]  ;;  %v517_v35 = vld [vmem:[%s4848_s9 + $0x18] sm:$0xff]  ;;  %v519_v39 = vld [vmem:[#allocation14 + $0x8] sm:$0xff] }
  0xbe   :  { %3708 = vmatpush3.bf16.msra.mxu0 %v3707_v9  ;;  %v4547_v30 = vpack.c.bf16 %v515_v25, %v514_v24  ;;  %v436_v33 = vld [vmem:[#allocation10 + $0x18] sm:$0xff]  ;;  %v4558_v37 = vpack.c.bf16 %v517_v35, %v516_v34  ;;  %v518_v38 = vld [vmem:[#allocation14] sm:$0xff]  ;;  %v523_v41 = vld [vmem:[#allocation16 + $0x8] sm:$0xff]  ;;  %p4258_p0 = pnand %p4257_p13, %p4251_p10 }
  0xbf   :  { %3715 = vmatprep.subr.bf16.mxu0 %v4298_v0  ;;  %3714 = vmatpush3.bf16.msra.mxu1 %v3713_v18  ;;  %v3725_v36 = vpack.c.bf16 %v436_v33, %v435_v31  ;;  %v522_v40 = vld [vmem:[#allocation16] sm:$0xff]  ;;  %v4567_v42 = vpack.c.bf16 %v519_v39, %v518_v38  ;;  %v520_v43 = vld [vmem:[#allocation14 + $0x10] sm:$0xff]  ;;  %v521_v44 = vld [vmem:[#allocation14 + $0x18] sm:$0xff] }
  0xc0   :  { %3721 = vmatprep.subr.bf16.mxu1 %v4298_v0  ;;  %v4571_v45 = vpack.c.bf16 %v523_v41, %v522_v40  ;;  %v524_v46 = vld [vmem:[#allocation16 + $0x10] sm:$0xff]  ;;  %v525_v47 = vld [vmem:[#allocation16 + $0x18] sm:$0xff]  ;;  %v4576_v48 = vpack.c.bf16 %v521_v44, %v520_v43  ;;  %v775_v50 = vld [vmem:[#allocation17] sm:$0xff] }
  0xc1   :  { %3316 = vmatmul.mubr.msk.f32.vlgmr.msra.gmra.mrb[0].mxu0 %vm193_vm1, %v181_v13  ;;  %v4582_v49 = vpack.c.bf16 %v525_v47, %v524_v46  ;;  %v776_v51 = vld [vmem:[#allocation17 + $0x8] sm:$0xff]  ;;  %v777_v52 = vld [vmem:[#allocation17 + $0x10] sm:$0xff]  ;;  %v778_v54 = vld [vmem:[#allocation17 + $0x18] sm:$0xff] }
  0xc2   :  { %3717 = vmatpush3.bf16.msra.mxu0 %v3716_v14  ;;  %3337 = vmatprep.mubr.msk.f32.mxu0 %vm4299_vm0, %v4300_v1  ;;  %v3746_v53 = vpack.c.bf16 %v776_v51, %v775_v50  ;;  %v3749_v55 = vpack.c.bf16 %v778_v54, %v777_v52  ;;  %v3074_v60 = vld [vmem:[%s4845_s6] ss:$0 sm:$0xff]  ;;  %v3076_v6 = vld [vmem:[#allocation11] ss:$0 sm:$0xff]  ;;  %v1089_v33 = vld [vmem:[#allocation17 + $0x20] sm:$0xff] }
  0xc3   :  { %3718 = vmatprep.subr.bf16.mxu0 %v4298_v0  ;;  %v4615_v16 = vld [vmem:[%s4851_s12] ss:$0 sm:$0xff]  ;;  %v1090_v34 = vld [vmem:[#allocation17 + $0x28] sm:$0xff]  ;;  %v1091_v35 = vld [vmem:[#allocation17 + $0x30] sm:$0xff] }
  0xc4   :  { %v1092_v38 = vld [vmem:[#allocation17 + $0x38] sm:$0xff] }
  0xc5   :  { %v3773_v39 = vpack.c.bf16 %v1092_v38, %v1091_v35 }
  0xc6   :  { %3720 = vmatpush3.bf16.msra.mxu0 %v3719_v20  ;;  %v3078_v20 = vld [vmem:[#allocation13] ss:$0 sm:$0xff] }
  0xc7   :  { %3727 = vmatprep.subr.bf16.mxu0 %v4298_v0 }
 0x194   :  { %v263_v26 = vpop.f32.mrb[0].mxu0 }
 0x195   :  { %v264_v27 = vadd.f32 %v3072_v21, %v263_v26  ;;  %v3317_v28 = vpop.f32.mrb[1].mxu0 }
 0x197   :  { %v267_v32 = vmax.f32 %v264_v27, 0.0 }
 0x199   :  { %3327 = vmatmul.mubr.msk.f32.vlgmr.msra.gmra.mrb[0].mxu1 %vm193_vm1, %v267_v32  ;;  %3338 = vmatmul.mubr.msk.f32.vlgmr.msra.gmra.mrb[2].mxu0 %vm193_vm1, %v267_v32 }
 0x19a   :  { %3723 = vmatpush3.bf16.msra.mxu1 %v3722_v29  ;;  %3729 = vmatpush3.bf16.msra.mxu0 %v4547_v30 }
 0x19b   :  { %3724 = vmatprep.subr.bf16.mxu1 %v4298_v0  ;;  %3730 = vmatprep.subr.bf16.mxu0 %v4298_v0 }
 0x19c   :  { %3348 = vmatprep.mubr.msk.f32.mxu1 %vm4299_vm0, %v4300_v1  ;;  %3359 = vmatprep.mubr.msk.f32.mxu0 %vm4299_vm0, %v4300_v1 }
 0x19e   :  { %3726 = vmatpush3.bf16.msra.mxu1 %v3725_v36  ;;  %3732 = vmatpush3.bf16.msra.mxu0 %v4558_v37  ;;  %v3770_v36 = vpack.c.bf16 %v1090_v34, %v1089_v33 }
 0x19f   :  { %3733 = vmatprep.subr.bf16.mxu1 %v4298_v0  ;;  %3739 = vmatprep.subr.bf16.mxu0 %v4298_v0 }
 0x1a1   :  { %3349 = vmatmul.mubr.msk.f32.vlgmr.msra.gmra.mrb[2].mxu1 %vm193_vm1, %v267_v32  ;;  %3360 = vmatmul.mubr.f32.vlgmr.msra.gmra.mrb[4].mxu0 %v4300_v1 }
 0x1a2   :  { %3735 = vmatpush3.bf16.msra.mxu1 %v4567_v42  ;;  %3370 = vmatprep.mubr.msk.f32.mxu1 %vm4299_vm0, %v4300_v1 }
 0x1a3   :  { %3736 = vmatprep.subr.bf16.mxu1 %v4298_v0  ;;  %3741 = vmatpush3.bf16.msra.mxu0 %v4571_v45 }
 0x1a4   :  { %3742 = vmatprep.subr.bf16.mxu0 %v4298_v0  ;;  %3381 = vmatprep.mubr.msk.f32.mxu0 %vm4299_vm0, %v4300_v1 }
 0x1a6   :  { %3738 = vmatpush3.bf16.msra.mxu1 %v4576_v48 }
 0x1a7   :  { %3744 = vmatpush3.bf16.msra.mxu0 %v4582_v49  ;;  %3745 = vmatprep.subr.bf16.mxu1 %v4298_v0 }
 0x1a8   :  { %3751 = vmatprep.subr.bf16.mxu0 %v4298_v0 }
 0x1a9   :  { %3371 = vmatmul.mubr.f32.vlgmr.msra.gmra.mrb[4].mxu1 %v4300_v1 }
 0x1aa   :  { %3382 = vmatmul.mubr.f32.vlgmr.msra.gmra.mrb[6].mxu0 %v4300_v1  ;;  %3392 = vmatprep.mubr.msk.f32.mxu1 %vm4299_vm0, %v4300_v1 }
 0x1ab   :  { %3753 = vmatpush3.bf16.msra.mxu0 %v4547_v30  ;;  %3403 = vmatprep.mubr.msk.f32.mxu0 %vm4299_vm0, %v4300_v1 }
 0x1ac   :  { %3754 = vmatprep.subr.bf16.mxu0 %v4298_v0  ;;  %3747 = vmatpush3.bf16.msra.mxu1 %v3746_v53 }
 0x1ad   :  { %3748 = vmatprep.subr.bf16.mxu1 %v4298_v0 }
 0x1af   :  { %3756 = vmatpush3.bf16.msra.mxu0 %v4558_v37 }
 0x1b0   :  { %3763 = vmatprep.subr.bf16.mxu0 %v4298_v0  ;;  %3750 = vmatpush3.bf16.msra.mxu1 %v3749_v55 }
 0x1b1   :  { %3757 = vmatprep.subr.bf16.mxu1 %v4298_v0 }
 0x26c   :  { %v348_v56 = vpop.f32.mrb[0].mxu1  ;;  %v429_v57 = vpop.f32.mrb[2].mxu0 }
 0x26d   :  { %v3328_v58 = vpop.f32.mrb[1].mxu1  ;;  %v3339_v59 = vpop.f32.mrb[3].mxu0  ;;  %v4606_v61 = vadd.f32 %v3074_v60, %v348_v56  ;;  %v4609_v7 = vadd.f32 %v3076_v6, %v429_v57 }
 0x274   :  { %v510_v62 = vpop.f32.mrb[2].mxu1  ;;  %v603_v63 = vpop.f32.mrb[4].mxu0 }
 0x275   :  { %v753_v2 = vadd.f32 %v603_v63, %v4606_v61  ;;  %v3350_v3 = vpop.f32.mrb[3].mxu1  ;;  %v3361_v4 = vpop.f32.mrb[5].mxu0  ;;  %v4618_v22 = vadd.f32 %v3078_v20, %v510_v62 }
 0x277   :  { %v3082_v5 = vmul.f32 -1.442695, %v753_v2 }
 0x279   :  { %3950 = vpow2.f32 %v3082_v5 }
 0x27c   :  { %v673_v8 = vpop.f32.mrb[4].mxu1 }
 0x27d   :  { %v760_v9 = vadd.f32 %v673_v8, %v4609_v7  ;;  %v3372_v10 = vpop.f32.mrb[5].mxu1  ;;  %v749_v11 = vpop.f32.mrb[6].mxu0 }
 0x27e   :  { %v3383_v12 = vpop.f32.mrb[7].mxu0  ;;  %v750_v19 = vadd.f32 %v4615_v16, %v749_v11  ;;  %v1404_v10 = vld [vmem:[#allocation17 + $0x48] sm:$0xff]  ;;  %v1405_v11 = vld [vmem:[#allocation17 + $0x50] sm:$0xff] }
 0x27f   :  { %v3083_v13 = vmul.f32 -1.442695, %v760_v9  ;;  %v1403_v9 = vld [vmem:[#allocation17 + $0x40] sm:$0xff] }
 0x280   :  { %v3794_v12 = vpack.c.bf16 %v1404_v10, %v1403_v9 }
 0x281   :  { %3952 = vpow2.f32 %v3083_v13  ;;  %v1406_v13 = vld [vmem:[#allocation17 + $0x58] sm:$0xff] }
 0x283   :  { %v3951_v14 = vpop.eup %3950 }
 0x284   :  { %v757_v15 = vadd.f32 1.0, %v3951_v14  ;;  %v3797_v14 = vpack.c.bf16 %v1406_v13, %v1405_v11 }
 0x286   :  { %3954 = vrcp.f32 %v757_v15 }
 0x28b   :  { %v3953_v17 = vpop.eup %3952 }
 0x28c   :  { %v764_v18 = vadd.f32 1.0, %v3953_v17 }
 0x28e   :  { %3956 = vrcp.f32 %v764_v18 }
 0x290   :  { %v3955_v21 = vpop.eup %3954 }
 0x291   :  { %v767_v23 = vmul.f32 %v3955_v21, %v750_v19 }
 0x293   :  { %v768_v24 = vadd.f32 %v767_v23, %v4618_v22 }
 0x295   :  { %3958 = vtanh.f32 %v768_v24 }
 0x298   :  { %v3957_v25 = vpop.eup %3956 }
 0x299   :  { %v770_v26 = vsub.f32 1.0, %v3957_v25  ;;  %v772_v29 = vmul.f32 0.0, %v3957_v25 }
 0x29f   :  { %v3959_v27 = vpop.eup %3958 }
 0x2a0   :  { %v771_v28 = vmul.f32 %v3959_v27, %v770_v26 }
 0x2a2   :  { %v773_v31 = vadd.f32 %v772_v29, %v771_v28 }
 0x2a4   :  { %3404 = vmatmul.mubr.msk.f32.vlgmr.msra.gmra.mrb[8].mxu0 %vm193_vm1, %v773_v31  ;;  %v774_v32 = vmax.f32 %v773_v31, 0.0 }
 0x2a5   :  { %3765 = vmatpush3.bf16.msra.mxu0 %v4571_v45  ;;  %3425 = vmatprep.mubr.msk.f32.mxu0 %vm4299_vm0, %v4300_v1 }
 0x2a6   :  { %3393 = vmatmul.mubr.msk.f32.vlgmr.msra.gmra.mrb[6].mxu1 %vm193_vm1, %v774_v32  ;;  %3766 = vmatprep.subr.bf16.mxu0 %v4298_v0 }
 0x2a7   :  { %3759 = vmatpush3.bf16.msra.mxu1 %v4567_v42  ;;  %3414 = vmatprep.mubr.msk.f32.mxu1 %vm4299_vm0, %v4300_v1 }
 0x2a8   :  { %3760 = vmatprep.subr.bf16.mxu1 %v4298_v0 }
 0x2a9   :  { %3768 = vmatpush3.bf16.msra.mxu0 %v4582_v49 }
 0x2aa   :  { %3775 = vmatprep.subr.bf16.mxu0 %v4298_v0 }
 0x2ab   :  { %3762 = vmatpush3.bf16.msra.mxu1 %v4576_v48 }
 0x2ac   :  { %3426 = vmatmul.mubr.msk.f32.vlgmr.msra.gmra.mrb[10].mxu0 %vm193_vm1, %v773_v31  ;;  %3769 = vmatprep.subr.bf16.mxu1 %v4298_v0 }
 0x2ad   :  { %3777 = vmatpush3.bf16.msra.mxu0 %v4547_v30  ;;  %3447 = vmatprep.mubr.msk.f32.mxu0 %vm4299_vm0, %v4300_v1 }
 0x2ae   :  { %3415 = vmatmul.mubr.msk.f32.vlgmr.msra.gmra.mrb[8].mxu1 %vm193_vm1, %v773_v31  ;;  %3778 = vmatprep.subr.bf16.mxu0 %v4298_v0 }
 0x2af   :  { %3436 = vmatprep.mubr.msk.f32.mxu1 %vm4299_vm0, %v4300_v1  ;;  %3771 = vmatpush3.bf16.msra.mxu1 %v3770_v36 }
 0x2b0   :  { %3772 = vmatprep.subr.bf16.mxu1 %v4298_v0 }
 0x2b1   :  { %3780 = vmatpush3.bf16.msra.mxu0 %v4558_v37 }
 0x2b2   :  { %3787 = vmatprep.subr.bf16.mxu0 %v4298_v0 }
 0x2b3   :  { %3774 = vmatpush3.bf16.msra.mxu1 %v3773_v39 }
 0x2b4   :  { %3781 = vmatprep.subr.bf16.mxu1 %v4298_v0 }
 0x377   :  { %v922_v40 = vpop.f32.mrb[8].mxu0 }
 0x378   :  { %v1066_v41 = vadd.f32 %v922_v40, %v4606_v61  ;;  %v3405_v43 = vpop.f32.mrb[9].mxu0 }
 0x37a   :  { %v3088_v44 = vmul.f32 -1.442695, %v1066_v41 }
 0x37c   :  { %3960 = vpow2.f32 %v3088_v44 }
 0x37f   :  { %v1062_v46 = vpop.f32.mrb[10].mxu0 }
 0x380   :  { %v3427_v47 = vpop.f32.mrb[11].mxu0  ;;  %v1063_v58 = vadd.f32 %v4615_v16, %v1062_v46  ;;  %v1717_v46 = vld [vmem:[#allocation17 + $0x60] sm:$0xff] }
 0x381   :  { %v992_v50 = vpop.f32.mrb[8].mxu1  ;;  %v1718_v47 = vld [vmem:[#allocation17 + $0x68] sm:$0xff] }
 0x382   :  { %v1073_v51 = vadd.f32 %v992_v50, %v4609_v7  ;;  %v3416_v52 = vpop.f32.mrb[9].mxu1  ;;  %v1719_v50 = vld [vmem:[#allocation17 + $0x70] sm:$0xff] }
 0x383   :  { %v1720_v52 = vld [vmem:[#allocation17 + $0x78] sm:$0xff] }
 0x384   :  { %v3089_v53 = vmul.f32 -1.442695, %v1073_v51  ;;  %v3818_v51 = vpack.c.bf16 %v1718_v47, %v1717_v46 }
 0x386   :  { %v3961_v54 = vpop.eup %3960  ;;  %3962 = vpow2.f32 %v3089_v53  ;;  %v3821_v53 = vpack.c.bf16 %v1720_v52, %v1719_v50 }
 0x387   :  { %v1070_v55 = vadd.f32 1.0, %v3961_v54 }
 0x389   :  { %3964 = vrcp.f32 %v1070_v55 }
 0x390   :  { %v3963_v56 = vpop.eup %3962 }
 0x391   :  { %v1077_v57 = vadd.f32 1.0, %v3963_v56 }
 0x393   :  { %v3965_v59 = vpop.eup %3964  ;;  %3966 = vrcp.f32 %v1077_v57 }
 0x394   :  { %v1080_v60 = vmul.f32 %v3965_v59, %v1063_v58 }
 0x396   :  { %v1081_v62 = vadd.f32 %v1080_v60, %v4618_v22 }
 0x398   :  { %3968 = vtanh.f32 %v1081_v62 }
 0x39d   :  { %v3967_v63 = vpop.eup %3966 }
 0x39e   :  { %v1083_v2 = vsub.f32 1.0, %v3967_v63  ;;  %v1085_v5 = vmul.f32 %v3967_v63, %v773_v31 }
 0x3a2   :  { %v3969_v3 = vpop.eup %3968 }
 0x3a3   :  { %v1084_v4 = vmul.f32 %v3969_v3, %v1083_v2 }
 0x3a5   :  { %v1086_v6 = vadd.f32 %v1085_v5, %v1084_v4 }
 0x3a7   :  { %3448 = vmatmul.mubr.msk.f32.vlgmr.msra.gmra.mrb[12].mxu0 %vm193_vm1, %v1086_v6  ;;  %v1087_v8 = vmax.f32 %v1086_v6, 0.0 }
 0x3a8   :  { %3789 = vmatpush3.bf16.msra.mxu0 %v4571_v45  ;;  %3469 = vmatprep.mubr.msk.f32.mxu0 %vm4299_vm0, %v4300_v1 }
 0x3a9   :  { %3437 = vmatmul.mubr.msk.f32.vlgmr.msra.gmra.mrb[6].mxu1 %vm193_vm1, %v1087_v8  ;;  %3790 = vmatprep.subr.bf16.mxu0 %v4298_v0 }
 0x3aa   :  { %3783 = vmatpush3.bf16.msra.mxu1 %v4567_v42  ;;  %3458 = vmatprep.mubr.msk.f32.mxu1 %vm4299_vm0, %v4300_v1 }
 0x3ab   :  { %3784 = vmatprep.subr.bf16.mxu1 %v4298_v0 }
 0x3ac   :  { %3792 = vmatpush3.bf16.msra.mxu0 %v4582_v49 }
 0x3ad   :  { %3799 = vmatprep.subr.bf16.mxu0 %v4298_v0 }
 0x3ae   :  { %3786 = vmatpush3.bf16.msra.mxu1 %v4576_v48 }
 0x3af   :  { %3470 = vmatmul.mubr.msk.f32.vlgmr.msra.gmra.mrb[14].mxu0 %vm193_vm1, %v1086_v6  ;;  %3793 = vmatprep.subr.bf16.mxu1 %v4298_v0 }
 0x3b0   :  { %3801 = vmatpush3.bf16.msra.mxu0 %v4547_v30  ;;  %3491 = vmatprep.mubr.msk.f32.mxu0 %vm4299_vm0, %v4300_v1 }
 0x3b1   :  { %3459 = vmatmul.mubr.msk.f32.vlgmr.msra.gmra.mrb[10].mxu1 %vm193_vm1, %v1086_v6  ;;  %3802 = vmatprep.subr.bf16.mxu0 %v4298_v0 }
 0x3b2   :  { %3480 = vmatprep.mubr.msk.f32.mxu1 %vm4299_vm0, %v4300_v1  ;;  %3795 = vmatpush3.bf16.msra.mxu1 %v3794_v12 }
 0x3b3   :  { %3796 = vmatprep.subr.bf16.mxu1 %v4298_v0 }
 0x3b4   :  { %3804 = vmatpush3.bf16.msra.mxu0 %v4558_v37 }
 0x3b5   :  { %3811 = vmatprep.subr.bf16.mxu0 %v4298_v0 }
 0x3b6   :  { %3798 = vmatpush3.bf16.msra.mxu1 %v3797_v14 }
 0x3b7   :  { %3805 = vmatprep.subr.bf16.mxu1 %v4298_v0 }
 0x47a   :  { %v1236_v15 = vpop.f32.mrb[12].mxu0 }
 0x47b   :  { %v1380_v17 = vadd.f32 %v1236_v15, %v4606_v61  ;;  %v3449_v18 = vpop.f32.mrb[13].mxu0 }
 0x47d   :  { %v3094_v19 = vmul.f32 -1.442695, %v1380_v17 }
 0x47f   :  { %3970 = vpow2.f32 %v3094_v19 }
 0x482   :  { %v1376_v20 = vpop.f32.mrb[14].mxu0 }
 0x483   :  { %v3471_v21 = vpop.f32.mrb[15].mxu0  ;;  %v1377_v32 = vadd.f32 %v4615_v16, %v1376_v20  ;;  %v2031_v20 = vld [vmem:[#allocation17 + $0x80] sm:$0xff] }
 0x484   :  { %v1306_v23 = vpop.f32.mrb[10].mxu1  ;;  %v2032_v21 = vld [vmem:[#allocation17 + $0x88] sm:$0xff] }
 0x485   :  { %v1387_v24 = vadd.f32 %v1306_v23, %v4609_v7  ;;  %v3460_v25 = vpop.f32.mrb[11].mxu1  ;;  %v2033_v23 = vld [vmem:[#allocation17 + $0x90] sm:$0xff] }
 0x486   :  { %v2034_v25 = vld [vmem:[#allocation17 + $0x98] sm:$0xff] }
 0x487   :  { %v3095_v26 = vmul.f32 -1.442695, %v1387_v24  ;;  %v3842_v24 = vpack.c.bf16 %v2032_v21, %v2031_v20 }
 0x489   :  { %v3971_v27 = vpop.eup %3970  ;;  %3972 = vpow2.f32 %v3095_v26  ;;  %v3845_v26 = vpack.c.bf16 %v2034_v25, %v2033_v23 }
 0x48a   :  { %v1384_v28 = vadd.f32 1.0, %v3971_v27 }
 0x48c   :  { %3974 = vrcp.f32 %v1384_v28 }
 0x493   :  { %v3973_v29 = vpop.eup %3972 }
 0x494   :  { %v1391_v31 = vadd.f32 1.0, %v3973_v29 }
 0x496   :  { %v3975_v33 = vpop.eup %3974  ;;  %3976 = vrcp.f32 %v1391_v31 }
 0x497   :  { %v1394_v34 = vmul.f32 %v3975_v33, %v1377_v32 }
 0x499   :  { %v1395_v35 = vadd.f32 %v1394_v34, %v4618_v22 }
 0x49b   :  { %3978 = vtanh.f32 %v1395_v35 }
 0x4a0   :  { %v3977_v36 = vpop.eup %3976 }
 0x4a1   :  { %v1397_v38 = vsub.f32 1.0, %v3977_v36  ;;  %v1399_v41 = vmul.f32 %v3977_v36, %v1086_v6 }
 0x4a5   :  { %v3979_v39 = vpop.eup %3978 }
 0x4a6   :  { %v1398_v40 = vmul.f32 %v3979_v39, %v1397_v38 }
 0x4a8   :  { %v1400_v43 = vadd.f32 %v1399_v41, %v1398_v40 }
 0x4aa   :  { %3492 = vmatmul.mubr.msk.f32.vlgmr.msra.gmra.mrb[16].mxu0 %vm193_vm1, %v1400_v43  ;;  %v1401_v44 = vmax.f32 %v1400_v43, 0.0 }
 0x4ab   :  { %3813 = vmatpush3.bf16.msra.mxu0 %v4571_v45  ;;  %3513 = vmatprep.mubr.msk.f32.mxu0 %vm4299_vm0, %v4300_v1 }
 0x4ac   :  { %3481 = vmatmul.mubr.msk.f32.vlgmr.msra.gmra.mrb[6].mxu1 %vm193_vm1, %v1401_v44  ;;  %3814 = vmatprep.subr.bf16.mxu0 %v4298_v0 }
 0x4ad   :  { %3807 = vmatpush3.bf16.msra.mxu1 %v4567_v42  ;;  %3502 = vmatprep.mubr.msk.f32.mxu1 %vm4299_vm0, %v4300_v1 }
 0x4ae   :  { %3808 = vmatprep.subr.bf16.mxu1 %v4298_v0 }
 0x4af   :  { %3816 = vmatpush3.bf16.msra.mxu0 %v4582_v49 }
 0x4b0   :  { %3823 = vmatprep.subr.bf16.mxu0 %v4298_v0 }
 0x4b1   :  { %3810 = vmatpush3.bf16.msra.mxu1 %v4576_v48 }
 0x4b2   :  { %3514 = vmatmul.mubr.msk.f32.vlgmr.msra.gmra.mrb[18].mxu0 %vm193_vm1, %v1400_v43  ;;  %3817 = vmatprep.subr.bf16.mxu1 %v4298_v0 }
 0x4b3   :  { %3825 = vmatpush3.bf16.msra.mxu0 %v4547_v30  ;;  %3535 = vmatprep.mubr.msk.f32.mxu0 %vm4299_vm0, %v4300_v1 }
 0x4b4   :  { %3503 = vmatmul.mubr.msk.f32.vlgmr.msra.gmra.mrb[12].mxu1 %vm193_vm1, %v1400_v43  ;;  %3826 = vmatprep.subr.bf16.mxu0 %v4298_v0 }
 0x4b5   :  { %3524 = vmatprep.mubr.msk.f32.mxu1 %vm4299_vm0, %v4300_v1  ;;  %3819 = vmatpush3.bf16.msra.mxu1 %v3818_v51 }
 0x4b6   :  { %3820 = vmatprep.subr.bf16.mxu1 %v4298_v0 }
 0x4b7   :  { %3828 = vmatpush3.bf16.msra.mxu0 %v4558_v37 }
 0x4b8   :  { %3835 = vmatprep.subr.bf16.mxu0 %v4298_v0 }
 0x4b9   :  { %3822 = vmatpush3.bf16.msra.mxu1 %v3821_v53 }
 0x4ba   :  { %3829 = vmatprep.subr.bf16.mxu1 %v4298_v0 }
 0x57d   :  { %v1550_v54 = vpop.f32.mrb[16].mxu0 }
 0x57e   :  { %v1694_v55 = vadd.f32 %v1550_v54, %v4606_v61  ;;  %v3493_v56 = vpop.f32.mrb[17].mxu0 }
 0x580   :  { %v3100_v57 = vmul.f32 -1.442695, %v1694_v55 }
 0x582   :  { %3980 = vpow2.f32 %v3100_v57 }
 0x585   :  { %v1690_v58 = vpop.f32.mrb[18].mxu0 }
 0x586   :  { %v3515_v59 = vpop.f32.mrb[19].mxu0  ;;  %v1691_v8 = vadd.f32 %v4615_v16, %v1690_v58  ;;  %v2345_v58 = vld [vmem:[#allocation17 + $0xa0] sm:$0xff] }
 0x587   :  { %v1620_v60 = vpop.f32.mrb[12].mxu1  ;;  %v2346_v59 = vld [vmem:[#allocation17 + $0xa8] sm:$0xff] }
 0x588   :  { %v1701_v62 = vadd.f32 %v1620_v60, %v4609_v7  ;;  %v3504_v63 = vpop.f32.mrb[13].mxu1  ;;  %v2347_v60 = vld [vmem:[#allocation17 + $0xb0] sm:$0xff] }
 0x589   :  { %v2348_v63 = vld [vmem:[#allocation17 + $0xb8] sm:$0xff] }
 0x58a   :  { %v3101_v2 = vmul.f32 -1.442695, %v1701_v62  ;;  %v3866_v62 = vpack.c.bf16 %v2346_v59, %v2345_v58 }
 0x58c   :  { %v3981_v3 = vpop.eup %3980  ;;  %3982 = vpow2.f32 %v3101_v2  ;;  %v3869_v2 = vpack.c.bf16 %v2348_v63, %v2347_v60 }
 0x58d   :  { %v1698_v4 = vadd.f32 1.0, %v3981_v3 }
 0x58f   :  { %3984 = vrcp.f32 %v1698_v4 }
 0x596   :  { %v3983_v5 = vpop.eup %3982 }
 0x597   :  { %v1705_v6 = vadd.f32 1.0, %v3983_v5 }
 0x599   :  { %v3985_v9 = vpop.eup %3984  ;;  %3986 = vrcp.f32 %v1705_v6 }
 0x59a   :  { %v1708_v10 = vmul.f32 %v3985_v9, %v1691_v8 }
 0x59c   :  { %v1709_v11 = vadd.f32 %v1708_v10, %v4618_v22 }
 0x59e   :  { %3988 = vtanh.f32 %v1709_v11 }
 0x5a3   :  { %v3987_v12 = vpop.eup %3986 }
 0x5a4   :  { %v1711_v13 = vsub.f32 1.0, %v3987_v12  ;;  %v1713_v17 = vmul.f32 %v3987_v12, %v1400_v43 }
 0x5a8   :  { %v3989_v14 = vpop.eup %3988 }
 0x5a9   :  { %v1712_v15 = vmul.f32 %v3989_v14, %v1711_v13 }
 0x5ab   :  { %v1714_v18 = vadd.f32 %v1713_v17, %v1712_v15 }
 0x5ad   :  { %3536 = vmatmul.mubr.msk.f32.vlgmr.msra.gmra.mrb[20].mxu0 %vm193_vm1, %v1714_v18  ;;  %v1715_v19 = vmax.f32 %v1714_v18, 0.0 }
 0x5ae   :  { %3837 = vmatpush3.bf16.msra.mxu0 %v4571_v45  ;;  %3557 = vmatprep.mubr.msk.f32.mxu0 %vm4299_vm0, %v4300_v1 }
 0x5af   :  { %3525 = vmatmul.mubr.msk.f32.vlgmr.msra.gmra.mrb[6].mxu1 %vm193_vm1, %v1715_v19  ;;  %3838 = vmatprep.subr.bf16.mxu0 %v4298_v0 }
 0x5b0   :  { %3831 = vmatpush3.bf16.msra.mxu1 %v4567_v42  ;;  %3546 = vmatprep.mubr.msk.f32.mxu1 %vm4299_vm0, %v4300_v1 }
 0x5b1   :  { %3832 = vmatprep.subr.bf16.mxu1 %v4298_v0 }
 0x5b2   :  { %3840 = vmatpush3.bf16.msra.mxu0 %v4582_v49 }
 0x5b3   :  { %3847 = vmatprep.subr.bf16.mxu0 %v4298_v0 }
 0x5b4   :  { %3834 = vmatpush3.bf16.msra.mxu1 %v4576_v48 }
 0x5b5   :  { %3558 = vmatmul.mubr.msk.f32.vlgmr.msra.gmra.mrb[22].mxu0 %vm193_vm1, %v1714_v18  ;;  %3841 = vmatprep.subr.bf16.mxu1 %v4298_v0 }
 0x5b6   :  { %3849 = vmatpush3.bf16.msra.mxu0 %v4547_v30  ;;  %3579 = vmatprep.mubr.msk.f32.mxu0 %vm4299_vm0, %v4300_v1 }
 0x5b7   :  { %3547 = vmatmul.mubr.msk.f32.vlgmr.msra.gmra.mrb[14].mxu1 %vm193_vm1, %v1714_v18  ;;  %3850 = vmatprep.subr.bf16.mxu0 %v4298_v0 }
 0x5b8   :  { %3568 = vmatprep.mubr.msk.f32.mxu1 %vm4299_vm0, %v4300_v1  ;;  %3843 = vmatpush3.bf16.msra.mxu1 %v3842_v24 }
 0x5b9   :  { %3844 = vmatprep.subr.bf16.mxu1 %v4298_v0 }
 0x5ba   :  { %3852 = vmatpush3.bf16.msra.mxu0 %v4558_v37 }
 0x5bb   :  { %3859 = vmatprep.subr.bf16.mxu0 %v4298_v0 }
 0x5bc   :  { %3846 = vmatpush3.bf16.msra.mxu1 %v3845_v26 }
 0x5bd   :  { %3853 = vmatprep.subr.bf16.mxu1 %v4298_v0 }
 0x680   :  { %v1864_v27 = vpop.f32.mrb[20].mxu0 }
 0x681   :  { %v2008_v28 = vadd.f32 %v1864_v27, %v4606_v61  ;;  %v3537_v29 = vpop.f32.mrb[21].mxu0 }
 0x683   :  { %v3106_v31 = vmul.f32 -1.442695, %v2008_v28 }
 0x685   :  { %3990 = vpow2.f32 %v3106_v31 }
 0x688   :  { %v2004_v32 = vpop.f32.mrb[22].mxu0 }
 0x689   :  { %v3559_v33 = vpop.f32.mrb[23].mxu0  ;;  %v2005_v44 = vadd.f32 %v4615_v16, %v2004_v32  ;;  %v2659_v32 = vld [vmem:[#allocation17 + $0xc0] sm:$0xff] }
 0x68a   :  { %v1934_v34 = vpop.f32.mrb[14].mxu1  ;;  %v2660_v33 = vld [vmem:[#allocation17 + $0xc8] sm:$0xff] }
 0x68b   :  { %v2015_v35 = vadd.f32 %v1934_v34, %v4609_v7  ;;  %v3548_v36 = vpop.f32.mrb[15].mxu1  ;;  %v2661_v34 = vld [vmem:[#allocation17 + $0xd0] sm:$0xff] }
 0x68c   :  { %v2662_v36 = vld [vmem:[#allocation17 + $0xd8] sm:$0xff] }
 0x68d   :  { %v3107_v38 = vmul.f32 -1.442695, %v2015_v35  ;;  %v3890_v35 = vpack.c.bf16 %v2660_v33, %v2659_v32  ;;  %v3080_v32 = vld [vmem:[%s4853_s14] ss:$0 sm:$0xff] }
 0x68f   :  { %v3991_v39 = vpop.eup %3990  ;;  %3992 = vpow2.f32 %v3107_v38 }
 0x690   :  { %v2012_v40 = vadd.f32 1.0, %v3991_v39 }
 0x692   :  { %3994 = vrcp.f32 %v2012_v40 }
 0x699   :  { %v3993_v41 = vpop.eup %3992 }
 0x69a   :  { %v2019_v43 = vadd.f32 1.0, %v3993_v41 }
 0x69c   :  { %v3995_v46 = vpop.eup %3994  ;;  %3996 = vrcp.f32 %v2019_v43 }
 0x69d   :  { %v2022_v47 = vmul.f32 %v3995_v46, %v2005_v44 }
 0x69f   :  { %v2023_v50 = vadd.f32 %v2022_v47, %v4618_v22 }
 0x6a1   :  { %3998 = vtanh.f32 %v2023_v50 }
 0x6a6   :  { %v3997_v51 = vpop.eup %3996 }
 0x6a7   :  { %v2025_v52 = vsub.f32 1.0, %v3997_v51  ;;  %v2027_v55 = vmul.f32 %v3997_v51, %v1714_v18 }
 0x6ab   :  { %v3999_v53 = vpop.eup %3998 }
 0x6ac   :  { %v2026_v54 = vmul.f32 %v3999_v53, %v2025_v52 }
 0x6ae   :  { %v2028_v56 = vadd.f32 %v2027_v55, %v2026_v54 }
 0x6b0   :  { %3580 = vmatmul.mubr.msk.f32.vlgmr.msra.gmra.mrb[24].mxu0 %vm193_vm1, %v2028_v56  ;;  %v2029_v57 = vmax.f32 %v2028_v56, 0.0 }
 0x6b1   :  { %3861 = vmatpush3.bf16.msra.mxu0 %v4571_v45  ;;  %3601 = vmatprep.mubr.msk.f32.mxu0 %vm4299_vm0, %v4300_v1 }
 0x6b2   :  { %3569 = vmatmul.mubr.msk.f32.vlgmr.msra.gmra.mrb[6].mxu1 %vm193_vm1, %v2029_v57  ;;  %3862 = vmatprep.subr.bf16.mxu0 %v4298_v0 }
 0x6b3   :  { %3855 = vmatpush3.bf16.msra.mxu1 %v4567_v42  ;;  %3590 = vmatprep.mubr.msk.f32.mxu1 %vm4299_vm0, %v4300_v1 }
 0x6b4   :  { %3856 = vmatprep.subr.bf16.mxu1 %v4298_v0 }
 0x6b5   :  { %3864 = vmatpush3.bf16.msra.mxu0 %v4582_v49 }
 0x6b6   :  { %3871 = vmatprep.subr.bf16.mxu0 %v4298_v0 }
 0x6b7   :  { %3858 = vmatpush3.bf16.msra.mxu1 %v4576_v48 }
 0x6b8   :  { %3602 = vmatmul.mubr.msk.f32.vlgmr.msra.gmra.mrb[26].mxu0 %vm193_vm1, %v2028_v56  ;;  %3865 = vmatprep.subr.bf16.mxu1 %v4298_v0 }
 0x6b9   :  { %3873 = vmatpush3.bf16.msra.mxu0 %v4547_v30  ;;  %3623 = vmatprep.mubr.msk.f32.mxu0 %vm4299_vm0, %v4300_v1 }
 0x6ba   :  { %3591 = vmatmul.mubr.msk.f32.vlgmr.msra.gmra.mrb[16].mxu1 %vm193_vm1, %v2028_v56  ;;  %3874 = vmatprep.subr.bf16.mxu0 %v4298_v0 }
 0x6bb   :  { %3612 = vmatprep.mubr.msk.f32.mxu1 %vm4299_vm0, %v4300_v1  ;;  %3867 = vmatpush3.bf16.msra.mxu1 %v3866_v62 }
 0x6bc   :  { %3868 = vmatprep.subr.bf16.mxu1 %v4298_v0 }
 0x6bd   :  { %3876 = vmatpush3.bf16.msra.mxu0 %v4558_v37 }
 0x6be   :  { %3883 = vmatprep.subr.bf16.mxu0 %v4298_v0 }
 0x6bf   :  { %3870 = vmatpush3.bf16.msra.mxu1 %v3869_v2 }
 0x6c0   :  { %3877 = vmatprep.subr.bf16.mxu1 %v4298_v0 }
 0x783   :  { %v2178_v3 = vpop.f32.mrb[24].mxu0 }
 0x784   :  { %v2322_v4 = vadd.f32 %v2178_v3, %v4606_v61  ;;  %v3581_v5 = vpop.f32.mrb[25].mxu0 }
 0x785   :  { %v2975_v5 = vld [vmem:[#allocation17 + $0xf0] sm:$0xff] }
 0x786   :  { %v3112_v6 = vmul.f32 -1.442695, %v2322_v4 }
 0x788   :  { %4000 = vpow2.f32 %v3112_v6 }
 0x78b   :  { %v2318_v8 = vpop.f32.mrb[26].mxu0 }
 0x78c   :  { %v3603_v9 = vpop.f32.mrb[27].mxu0  ;;  %v2319_v19 = vadd.f32 %v4615_v16, %v2318_v8  ;;  %v2976_v8 = vld [vmem:[#allocation17 + $0xf8] sm:$0xff] }
 0x78d   :  { %v2248_v10 = vpop.f32.mrb[16].mxu1  ;;  %v3917_v9 = vpack.c.bf16 %v2976_v8, %v2975_v5 }
 0x78e   :  { %v2329_v11 = vadd.f32 %v2248_v10, %v4609_v7  ;;  %v3592_v12 = vpop.f32.mrb[17].mxu1 }
 0x790   :  { %v3113_v13 = vmul.f32 -1.442695, %v2329_v11 }
 0x792   :  { %v4001_v14 = vpop.eup %4000  ;;  %4002 = vpow2.f32 %v3113_v13 }
 0x793   :  { %v2326_v15 = vadd.f32 1.0, %v4001_v14 }
 0x795   :  { %4004 = vrcp.f32 %v2326_v15 }
 0x79c   :  { %v4003_v17 = vpop.eup %4002 }
 0x79d   :  { %v2333_v18 = vadd.f32 1.0, %v4003_v17 }
 0x79f   :  { %v4005_v20 = vpop.eup %4004  ;;  %4006 = vrcp.f32 %v2333_v18 }
 0x7a0   :  { %v2336_v21 = vmul.f32 %v4005_v20, %v2319_v19 }
 0x7a2   :  { %v2337_v23 = vadd.f32 %v2336_v21, %v4618_v22 }
 0x7a4   :  { %4008 = vtanh.f32 %v2337_v23 }
 0x7a9   :  { %v4007_v24 = vpop.eup %4006 }
 0x7aa   :  { %v2339_v25 = vsub.f32 1.0, %v4007_v24  ;;  %v2341_v28 = vmul.f32 %v4007_v24, %v2028_v56 }
 0x7ae   :  { %v4009_v26 = vpop.eup %4008 }
 0x7af   :  { %v2340_v27 = vmul.f32 %v4009_v26, %v2339_v25 }
 0x7b1   :  { %v2342_v29 = vadd.f32 %v2341_v28, %v2340_v27 }
 0x7b3   :  { %3624 = vmatmul.mubr.msk.f32.vlgmr.msra.gmra.mrb[28].mxu0 %vm193_vm1, %v2342_v29  ;;  %v2343_v31 = vmax.f32 %v2342_v29, 0.0 }
 0x7b4   :  { %3885 = vmatpush3.bf16.msra.mxu0 %v4571_v45  ;;  %3645 = vmatprep.mubr.msk.f32.mxu0 %vm4299_vm0, %v4300_v1 }
 0x7b5   :  { %3613 = vmatmul.mubr.msk.f32.vlgmr.msra.gmra.mrb[6].mxu1 %vm193_vm1, %v2343_v31  ;;  %3886 = vmatprep.subr.bf16.mxu0 %v4298_v0 }
 0x7b6   :  { %3879 = vmatpush3.bf16.msra.mxu1 %v4567_v42  ;;  %3634 = vmatprep.mubr.msk.f32.mxu1 %vm4299_vm0, %v4300_v1 }
 0x7b7   :  { %3880 = vmatprep.subr.bf16.mxu1 %v4298_v0 }
 0x7b8   :  { %3888 = vmatpush3.bf16.msra.mxu0 %v4582_v49 }
 0x7b9   :  { %3895 = vmatprep.subr.bf16.mxu0 %v4298_v0 }
 0x7ba   :  { %3882 = vmatpush3.bf16.msra.mxu1 %v4576_v48 }
 0x7bb   :  { %3646 = vmatmul.mubr.msk.f32.vlgmr.msra.gmra.mrb[30].mxu0 %vm193_vm1, %v2342_v29  ;;  %3889 = vmatprep.subr.bf16.mxu1 %v4298_v0 }
 0x7bc   :  { %3897 = vmatpush3.bf16.msra.mxu0 %v4547_v30  ;;  %3667 = vmatprep.mubr.msk.f32.mxu0 %vm4299_vm0, %v4300_v1  ;;  %v3893_v30 = vpack.c.bf16 %v2662_v36, %v2661_v34 }
 0x7bd   :  { %3635 = vmatmul.mubr.msk.f32.vlgmr.msra.gmra.mrb[18].mxu1 %vm193_vm1, %v2342_v29  ;;  %3898 = vmatprep.subr.bf16.mxu0 %v4298_v0 }
 0x7be   :  { %3656 = vmatprep.mubr.msk.f32.mxu1 %vm4299_vm0, %v4300_v1  ;;  %3891 = vmatpush3.bf16.msra.mxu1 %v3890_v35 }
 0x7bf   :  { %3892 = vmatprep.subr.bf16.mxu1 %v4298_v0 }
 0x7c0   :  { %3900 = vmatpush3.bf16.msra.mxu0 %v4558_v37 }
 0x7c1   :  { %3907 = vmatprep.subr.bf16.mxu0 %v4298_v0 }
 0x7c2   :  { %3894 = vmatpush3.bf16.msra.mxu1 %v3893_v30 }
 0x7c3   :  { %3901 = vmatprep.subr.bf16.mxu1 %v4298_v0 }
 0x886   :  { %v2492_v38 = vpop.f32.mrb[28].mxu0 }
 0x887   :  { %v2636_v39 = vadd.f32 %v2492_v38, %v4606_v61  ;;  %v3625_v40 = vpop.f32.mrb[29].mxu0 }
 0x889   :  { %v3118_v41 = vmul.f32 -1.442695, %v2636_v39 }
 0x88b   :  { %4010 = vpow2.f32 %v3118_v41 }
 0x88e   :  { %v2632_v37 = vpop.f32.mrb[30].mxu0 }
 0x88f   :  { %v3647_v43 = vpop.f32.mrb[31].mxu0  ;;  %v2633_v55 = vadd.f32 %v4615_v16, %v2632_v37 }
 0x890   :  { %v2562_v44 = vpop.f32.mrb[18].mxu1 }
 0x891   :  { %v2643_v46 = vadd.f32 %v2562_v44, %v4609_v7  ;;  %v3636_v47 = vpop.f32.mrb[19].mxu1 }
 0x893   :  { %v3119_v50 = vmul.f32 -1.442695, %v2643_v46 }
 0x895   :  { %v4011_v51 = vpop.eup %4010  ;;  %4012 = vpow2.f32 %v3119_v50 }
 0x896   :  { %v2640_v52 = vadd.f32 1.0, %v4011_v51 }
 0x898   :  { %4014 = vrcp.f32 %v2640_v52 }
 0x89f   :  { %v4013_v53 = vpop.eup %4012 }
 0x8a0   :  { %v2647_v54 = vadd.f32 1.0, %v4013_v53 }
 0x8a2   :  { %v4015_v56 = vpop.eup %4014  ;;  %4016 = vrcp.f32 %v2647_v54 }
 0x8a3   :  { %v2650_v57 = vmul.f32 %v4015_v56, %v2633_v55 }
 0x8a5   :  { %v2651_v58 = vadd.f32 %v2650_v57, %v4618_v22 }
 0x8a7   :  { %4018 = vtanh.f32 %v2651_v58 }
 0x8ac   :  { %v4017_v59 = vpop.eup %4016 }
 0x8ad   :  { %v2653_v60 = vsub.f32 1.0, %v4017_v59  ;;  %v2655_v2 = vmul.f32 %v4017_v59, %v2342_v29 }
 0x8b1   :  { %v4019_v62 = vpop.eup %4018 }
 0x8b2   :  { %v2654_v63 = vmul.f32 %v4019_v62, %v2653_v60 }
 0x8b4   :  { %v2656_v3 = vadd.f32 %v2655_v2, %v2654_v63 }
 0x8b6   :  { %3668 = vmatmul.mubr.msk.f32.vlgmr.msra.gmra.mrb[32].mxu0 %vm193_vm1, %v2656_v3  ;;  %v2657_v4 = vmax.f32 %v2656_v3, 0.0 }
 0x8b7   :  { %3909 = vmatpush3.bf16.msra.mxu0 %v4571_v45  ;;  %3689 = vmatprep.mubr.msk.f32.mxu0 %vm4299_vm0, %v4300_v1  ;;  %v2973_v45 = vld [vmem:[#allocation17 + $0xe0] sm:$0xff] }
 0x8b8   :  { %3657 = vmatmul.mubr.msk.f32.vlgmr.msra.gmra.mrb[6].mxu1 %vm193_vm1, %v2657_v4  ;;  %3910 = vmatprep.subr.bf16.mxu0 %v4298_v0 }
 0x8b9   :  { %3903 = vmatpush3.bf16.msra.mxu1 %v4567_v42  ;;  %3678 = vmatprep.mubr.msk.f32.mxu1 %vm4299_vm0, %v4300_v1  ;;  %v2974_v42 = vld [vmem:[#allocation17 + $0xe8] sm:$0xff] }
 0x8ba   :  { %3904 = vmatprep.subr.bf16.mxu1 %v4298_v0  ;;  %v3914_v6 = vpack.c.bf16 %v2974_v42, %v2973_v45 }
 0x8bb   :  { %3912 = vmatpush3.bf16.msra.mxu0 %v4582_v49 }
 0x8bd   :  { %3906 = vmatpush3.bf16.msra.mxu1 %v4576_v48 }
 0x8be   :  { %3690 = vmatmul.mubr.msk.f32.vlgmr.msra.gmra.mrb[34].mxu0 %vm193_vm1, %v2656_v3  ;;  %3913 = vmatprep.subr.bf16.mxu1 %v4298_v0 }
 0x8c0   :  { %3679 = vmatmul.mubr.msk.f32.vlgmr.msra.gmra.mrb[20].mxu1 %vm193_vm1, %v2656_v3 }
 0x8c1   :  { %3700 = vmatprep.mubr.msk.f32.mxu1 %vm4299_vm0, %v4300_v1  ;;  %3915 = vmatpush3.bf16.msra.mxu1 %v3914_v6 }
 0x8c2   :  { %3916 = vmatprep.subr.bf16.mxu1 %v4298_v0 }
 0x8c5   :  { %3918 = vmatpush3.bf16.msra.mxu1 %v3917_v9 }
 0x989   :  { %v2806_v48 = vpop.f32.mrb[32].mxu0 }
 0x98a   :  { %v2950_v49 = vadd.f32 %v2806_v48, %v4606_v61  ;;  %v3669_v10 = vpop.f32.mrb[33].mxu0 }
 0x98c   :  { %v3124_v11 = vmul.f32 -1.442695, %v2950_v49 }
 0x98e   :  { %4020 = vpow2.f32 %v3124_v11 }
 0x991   :  { %v2946_v12 = vpop.f32.mrb[34].mxu0 }
 0x992   :  { %v3691_v13 = vpop.f32.mrb[35].mxu0  ;;  %v2947_v21 = vadd.f32 %v4615_v16, %v2946_v12 }
 0x993   :  { %v2876_v14 = vpop.f32.mrb[20].mxu1 }
 0x994   :  { %v2957_v1 = vadd.f32 %v2876_v14, %v4609_v7  ;;  %v3680_v15 = vpop.f32.mrb[21].mxu1 }
 0x996   :  { %v3125_v17 = vmul.f32 -1.442695, %v2957_v1 }
 0x998   :  { %v4021_v18 = vpop.eup %4020  ;;  %4022 = vpow2.f32 %v3125_v17 }
 0x999   :  { %v2954_v19 = vadd.f32 1.0, %v4021_v18 }
 0x99b   :  { %4024 = vrcp.f32 %v2954_v19 }
 0x9a2   :  { %v4023_v20 = vpop.eup %4022 }
 0x9a3   :  { %v2961_v0 = vadd.f32 1.0, %v4023_v20 }
 0x9a5   :  { %v4025_v23 = vpop.eup %4024  ;;  %4026 = vrcp.f32 %v2961_v0 }
 0x9a6   :  { %v2964_v61 = vmul.f32 %v4025_v23, %v2947_v21 }
 0x9a8   :  { %v2965_v24 = vadd.f32 %v2964_v61, %v4618_v22 }
 0x9aa   :  { %4028 = vtanh.f32 %v2965_v24 }
 0x9af   :  { %v4027_v25 = vpop.eup %4026 }
 0x9b0   :  { %v2967_v26 = vsub.f32 1.0, %v4027_v25  ;;  %v2969_v28 = vmul.f32 %v4027_v25, %v2656_v3 }
 0x9b4   :  { %v4029_v27 = vpop.eup %4028 }
 0x9b5   :  { %v2968_v7 = vmul.f32 %v4029_v27, %v2967_v26 }
 0x9b7   :  { %v2970_v29 = vadd.f32 %v2969_v28, %v2968_v7 }
 0x9b9   :  { %v2971_v31 = vmax.f32 %v2970_v29, 0.0 }
 0x9bb   :  { %3701 = vmatmul.mubr.msk.f32.vlgmr.msra.gmra.mrb[6].mxu1 %vm193_vm1, %v2971_v31 }
 0xa8e   :  { %v3046_v16 = vpop.f32.mrb[6].mxu1 }
 0xa8f   :  { %v3919_v33 = vadd.f32 %v3080_v32, %v3046_v16  ;;  %v3702_v34 = vpop.f32.mrb[7].mxu1 }
 0xa91   :  { %3051 = vst [vmem:[#allocation19] sm:$0x3] %v3919_v33 }
 0xa92   :  { %4261 = shalt.err (!%p4258_p0)
}
 0xa93   :  { %s4857_s30 = sld [smem:[#allocation27_spill]] }
 0xa99   :  { %s4262_s19 = scalar_lea.hbm %s4857_s30, 32 }
 0xa9a   :  { %p4263_p1 = scmp.ne.s32.totalorder %s4857_s30, %s4262_s19  ;;  %p4266_p2 = scmp.lt.u32.totalorder %s4262_s19, %s4857_s30 }
 0xa9c   :  { %p4268_p3 = pnand %p4266_p2, %p4263_p1 }
 0xa9e   :  { %4271 = shalt.err (!%p4268_p3)
}
 0xa9f   :  { %3061 = dma.vmem_to_hbm [thread:$0]  %s3059_s25, 32, %s4857_s30, [#allocation4]  }
 0xaa0   :  { %4284 = dma.done.wait [#allocation4], 32  }
 0xaa1   :  { %4285 = vsyncadd [#allocation4], 4294967264 }
 0xaa2   :  { %3065 = vsyncpa [#allocation3], 1 }
 0xaa3   :  { %3066 = vsyncpa [#allocation6], 1 }
 0xaa4   :  { %3067 = vsyncpa [#allocation9], 1 }
 0xaa5   :  { %3068 = vsyncpa [#allocation12], 1 }
 0xaa6   :  { %3069 = vsyncpa [#allocation15], 1 }
 0xaa7   :  { %3070 = vsyncpa [#allocation18], 1 }
 0xaa8   :  { %3071 = vsyncpa [#allocation4], 1 }

</bundles_post_ra>
